<compile_context>
chip_gen: v6e
topology: v6e:2x2x1
jax: 0.10.0
libtpu: 0.0.40
codegen_flags: <defaults>
</compile_context>

<pallas_src>
import functools
import jax
import jax.numpy as jnp
from jax.experimental import pallas as pl
from jax.experimental.pallas import tpu as pltpu

# ----------------- mini-RoBERTa config (stand-in for 'roberta-base') -----------------
VOCAB     = 100
MAX_POS   = 16
HIDDEN    = 32
N_HEADS   = 4
HEAD_DIM  = HIDDEN // N_HEADS
FFN       = 64
N_LAYERS  = 2
N_CLASSES = 6
LN_EPS    = 1e-5
B, S      = 2, 8          # batch, seq
LOGIT_PAD = 128           # lane-dense classification-head width


def _ln(x, g, b):
    x = x.astype(jnp.float32)
    mu = jnp.mean(x, axis=-1, keepdims=True)
    var = jnp.mean((x - mu) ** 2, axis=-1, keepdims=True)
    return (x - mu) * jax.lax.rsqrt(var + LN_EPS) * g + b


# ----------------- fused encoder kernel (grid over layers) -----------------

def _fused_encoder_kernel(
        emb_ref, bias_ref, eg_ref, eb_ref,
        wqkv_ref, bqkv_ref, wo_ref, bo_ref, ln1g_ref, ln1b_ref,
        w1_ref, b1_ref, w2_ref, b2_ref, ln2g_ref, ln2b_ref,
        pw_ref, pb_ref, ow_ref, ob_ref,
        logits_ref, pooled_ref, h_sc):
    layer = pl.program_id(0)

    # --- step 0: embedding LayerNorm into the resident activation scratch ---
    @pl.when(layer == 0)
    def _():
        h_sc[...] = _ln(emb_ref[...], eg_ref[...], eb_ref[...]).astype(h_sc.dtype)

    x = h_sc[...]                                                   # [B*S, H]

    # --- fused QKV projection (single MXU call) ---
    qkv = jnp.dot(x, wqkv_ref[0], preferred_element_type=jnp.float32) + bqkv_ref[0]
    scale = 1.0 / (HEAD_DIM ** 0.5)
    bias = bias_ref[...]                                            # [B, 1, S] additive mask

    # --- per-head attention, output projection applied per-head and summed ---
    attn_out = jnp.zeros((B * S, HIDDEN), jnp.float32)
    for hd in range(N_HEADS):                                       # static unroll (4)
        lo = hd * HEAD_DIM
        qh = qkv[:, lo:lo + HEAD_DIM].reshape(B, S, HEAD_DIM)
        kh = qkv[:, HIDDEN + lo:HIDDEN + lo + HEAD_DIM].reshape(B, S, HEAD_DIM)
        vh = qkv[:, 2 * HIDDEN + lo:2 * HIDDEN + lo + HEAD_DIM].reshape(B, S, HEAD_DIM)

        s = jnp.einsum('bqd,bkd->bqk', qh, kh,
                       preferred_element_type=jnp.float32) * scale
        s = s + bias
        m = jnp.max(s, axis=-1, keepdims=True)
        p = jnp.exp(s - m)
        p = p * pl.reciprocal(jnp.sum(p, axis=-1, keepdims=True), approx=True)
        ctx_h = jnp.einsum('bqk,bkd->bqd', p, vh,
                           preferred_element_type=jnp.float32)      # [B, S, D]
        # concat(heads) @ Wo == sum_h ctx_h @ Wo[h*D:(h+1)*D, :]
        attn_out = attn_out + jnp.dot(ctx_h.reshape(B * S, HEAD_DIM),
                                      wo_ref[0][lo:lo + HEAD_DIM, :],
                                      preferred_element_type=jnp.float32)
    attn_out = attn_out + bo_ref[0]

    # --- post-LN residual block 1 ---
    h1 = _ln(x + attn_out, ln1g_ref[0], ln1b_ref[0])

    # --- FFN ---
    hmid = jnp.dot(h1, w1_ref[0], preferred_element_type=jnp.float32) + b1_ref[0]
    hmid = jax.nn.gelu(hmid, approximate=True)   # TODO(synk): exact erf GELU for HF parity
    ff = jnp.dot(hmid, w2_ref[0], preferred_element_type=jnp.float32) + b2_ref[0]

    # --- post-LN residual block 2, write back to the resident activation ---
    h2 = _ln(h1 + ff, ln2g_ref[0], ln2b_ref[0])
    h_sc[...] = h2.astype(h_sc.dtype)

    # --- final step: pooler + (eval-mode dropout) + lane-dense classification head ---
    @pl.when(layer == pl.num_programs(0) - 1)
    def _():
        cls_tok = h2.reshape(B, S, HIDDEN)[:, 0, :]                 # [B, H]
        pooled = jnp.tanh(jnp.dot(cls_tok, pw_ref[...],
                                  preferred_element_type=jnp.float32) + pb_ref[...])
        pooled_ref[...] = pooled.astype(pooled_ref.dtype)
        # dropout p=0.3 runs in eval mode -> identity
        logits_ref[...] = (jnp.dot(pooled, ow_ref[...],
                                   preferred_element_type=jnp.float32)
                           + ob_ref[...]).astype(logits_ref.dtype)


# ----------------- parameter init (deterministic, stacked per-layer weights) -----------------

def init_params(key):
    def nrm(k, shape, scale=0.02):
        return scale * jax.random.normal(k, shape, dtype=jnp.float32)

    keys = iter(jax.random.split(key, 16))
    return {
        'word_emb': nrm(next(keys), (VOCAB, HIDDEN)),
        'pos_emb':  nrm(next(keys), (MAX_POS, HIDDEN)),
        'emb_ln_g': jnp.ones((HIDDEN,), jnp.float32),
        'emb_ln_b': jnp.zeros((HIDDEN,), jnp.float32),
        # stacked per-layer weights: leading layer axis -> grid-pipelined weight DMA
        'wqkv': nrm(next(keys), (N_LAYERS, HIDDEN, 3 * HIDDEN)),
        'bqkv': jnp.zeros((N_LAYERS, 3 * HIDDEN), jnp.float32),
        'wo':   nrm(next(keys), (N_LAYERS, HIDDEN, HIDDEN)),
        'bo':   jnp.zeros((N_LAYERS, HIDDEN), jnp.float32),
        'ln1_g': jnp.ones((N_LAYERS, HIDDEN), jnp.float32),
        'ln1_b': jnp.zeros((N_LAYERS, HIDDEN), jnp.float32),
        'w1':   nrm(next(keys), (N_LAYERS, HIDDEN, FFN)),
        'b1':   jnp.zeros((N_LAYERS, FFN), jnp.float32),
        'w2':   nrm(next(keys), (N_LAYERS, FFN, HIDDEN)),
        'b2':   jnp.zeros((N_LAYERS, HIDDEN), jnp.float32),
        'ln2_g': jnp.ones((N_LAYERS, HIDDEN), jnp.float32),
        'ln2_b': jnp.zeros((N_LAYERS, HIDDEN), jnp.float32),
        'pool_w': nrm(next(keys), (HIDDEN, HIDDEN)),
        'pool_b': jnp.zeros((HIDDEN,), jnp.float32),
        'out_w': nrm(next(keys), (HIDDEN, N_CLASSES)),
        'out_b': jnp.zeros((N_CLASSES,), jnp.float32),
    }


# ----------------- forward pass -----------------

def emotion_classifier_forward(params, input_ids, attention_mask):
    """Returns (logits [B, n_classes], pooled_output [B, hidden]) — mirrors
    `return (self.out(self.drop(op[1])), op[1])` with eval-mode dropout."""

    # embeddings (gather is XLA glue)
    pos_ids = jnp.arange(S)[None, :]
    emb = (params['word_emb'][input_ids] + params['pos_emb'][pos_ids]) \
        .reshape(B * S, HIDDEN).astype(jnp.float32)

    # additive attention bias: 0 for real tokens, -1e9 for padding
    bias = ((1.0 - attention_mask.astype(jnp.float32)) * -1e9).reshape(B, 1, S)

    # lane-dense (128-wide) classification head: pad weights once
    out_w_pad = jnp.zeros((HIDDEN, LOGIT_PAD), jnp.float32).at[:, :N_CLASSES].set(params['out_w'])
    out_b_pad = jnp.zeros((1, LOGIT_PAD), jnp.float32).at[:, :N_CLASSES].set(params['out_b'])

    def c3(a):  # [N_LAYERS, N] -> [N_LAYERS, 1, N] for in-kernel broadcast
        return a.reshape(N_LAYERS, 1, -1)

    grid_spec = pltpu.PrefetchScalarGridSpec(
        num_scalar_prefetch=0,
        grid=(N_LAYERS,),
        in_specs=[
            pl.BlockSpec((B * S, HIDDEN), lambda l: (0, 0)),              # emb
            pl.BlockSpec((B, 1, S), lambda l: (0, 0, 0)),                 # mask bias
            pl.BlockSpec((1, HIDDEN), lambda l: (0, 0)),                  # emb_ln_g
            pl.BlockSpec((1, HIDDEN), lambda l: (0, 0)),                  # emb_ln_b
            pl.BlockSpec((1, HIDDEN, 3 * HIDDEN), lambda l: (l, 0, 0)),   # wqkv
            pl.BlockSpec((1, 1, 3 * HIDDEN), lambda l: (l, 0, 0)),        # bqkv
            pl.BlockSpec((1, HIDDEN, HIDDEN), lambda l: (l, 0, 0)),       # wo
            pl.BlockSpec((1, 1, HIDDEN), lambda l: (l, 0, 0)),            # bo
            pl.BlockSpec((1, 1, HIDDEN), lambda l: (l, 0, 0)),            # ln1_g
            pl.BlockSpec((1, 1, HIDDEN), lambda l: (l, 0, 0)),            # ln1_b
            pl.BlockSpec((1, HIDDEN, FFN), lambda l: (l, 0, 0)),          # w1
            pl.BlockSpec((1, 1, FFN), lambda l: (l, 0, 0)),               # b1
            pl.BlockSpec((1, FFN, HIDDEN), lambda l: (l, 0, 0)),          # w2
            pl.BlockSpec((1, 1, HIDDEN), lambda l: (l, 0, 0)),            # b2
            pl.BlockSpec((1, 1, HIDDEN), lambda l: (l, 0, 0)),            # ln2_g
            pl.BlockSpec((1, 1, HIDDEN), lambda l: (l, 0, 0)),            # ln2_b
            pl.BlockSpec((HIDDEN, HIDDEN), lambda l: (0, 0)),             # pool_w
            pl.BlockSpec((1, HIDDEN), lambda l: (0, 0)),                  # pool_b
            pl.BlockSpec((HIDDEN, LOGIT_PAD), lambda l: (0, 0)),          # out_w (padded)
            pl.BlockSpec((1, LOGIT_PAD), lambda l: (0, 0)),               # out_b (padded)
        ],
        out_specs=[
            pl.BlockSpec((B, LOGIT_PAD), lambda l: (0, 0)),               # logits (lane-dense)
            pl.BlockSpec((B, HIDDEN), lambda l: (0, 0)),                  # pooled
        ],
        scratch_shapes=[pltpu.VMEM((B * S, HIDDEN), jnp.float32)],        # resident activations
    )

    logits_pad, pooled = pl.pallas_call(
        _fused_encoder_kernel,
        out_shape=(jax.ShapeDtypeStruct((B, LOGIT_PAD), jnp.float32),
                   jax.ShapeDtypeStruct((B, HIDDEN), jnp.float32)),
        grid_spec=grid_spec,
        compiler_params=pltpu.CompilerParams(dimension_semantics=("arbitrary",)),
    )(emb, bias,
      params['emb_ln_g'].reshape(1, HIDDEN), params['emb_ln_b'].reshape(1, HIDDEN),
      params['wqkv'], c3(params['bqkv']),
      params['wo'], c3(params['bo']),
      c3(params['ln1_g']), c3(params['ln1_b']),
      params['w1'], c3(params['b1']),
      params['w2'], c3(params['b2']),
      c3(params['ln2_g']), c3(params['ln2_b']),
      params['pool_w'], params['pool_b'].reshape(1, HIDDEN),
      out_w_pad, out_b_pad)

    logits = logits_pad[:, :N_CLASSES]
    return logits, pooled


# ----------------- main -----------------

if __name__ == "__main__":
    root = jax.random.PRNGKey(0)
    k_param, k_ids = jax.random.split(root)

    params = init_params(k_param)

    input_ids = jax.random.randint(k_ids, (B, S), 0, VOCAB, dtype=jnp.int32)
    attention_mask = jnp.array([[1, 1, 1, 1, 1, 1, 1, 1],
                                [1, 1, 1, 1, 1, 1, 0, 0]], dtype=jnp.int32)

    fwd = jax.jit(functools.partial(emotion_classifier_forward, params))
    logits, pooled = fwd(input_ids, attention_mask)
    jax.block_until_ready((logits, pooled))

    assert logits.shape == (B, N_CLASSES) and pooled.shape == (B, HIDDEN)
    assert bool(jnp.all(jnp.isfinite(logits))) and bool(jnp.all(jnp.isfinite(pooled)))
    print("KERNEL_OK")
</pallas_src>

<mosaic_0001>
module attributes {stable_mosaic.version = 11 : i64} {
  func.func @_fused_encoder_kernel(%arg0: i32, %arg1: memref<16x32xf32, #tpu.memory_space<vmem>>, %arg2: memref<2x1x8xf32, #tpu.memory_space<vmem>>, %arg3: memref<1x32xf32, #tpu.memory_space<vmem>>, %arg4: memref<1x32xf32, #tpu.memory_space<vmem>>, %arg5: memref<1x32x96xf32, #tpu.memory_space<vmem>>, %arg6: memref<1x1x96xf32, #tpu.memory_space<vmem>>, %arg7: memref<1x32x32xf32, #tpu.memory_space<vmem>>, %arg8: memref<1x1x32xf32, #tpu.memory_space<vmem>>, %arg9: memref<1x1x32xf32, #tpu.memory_space<vmem>>, %arg10: memref<1x1x32xf32, #tpu.memory_space<vmem>>, %arg11: memref<1x32x64xf32, #tpu.memory_space<vmem>>, %arg12: memref<1x1x64xf32, #tpu.memory_space<vmem>>, %arg13: memref<1x64x32xf32, #tpu.memory_space<vmem>>, %arg14: memref<1x1x32xf32, #tpu.memory_space<vmem>>, %arg15: memref<1x1x32xf32, #tpu.memory_space<vmem>>, %arg16: memref<1x1x32xf32, #tpu.memory_space<vmem>>, %arg17: memref<32x32xf32, #tpu.memory_space<vmem>>, %arg18: memref<1x32xf32, #tpu.memory_space<vmem>>, %arg19: memref<32x128xf32, #tpu.memory_space<vmem>>, %arg20: memref<1x128xf32, #tpu.memory_space<vmem>>, %arg21: memref<2x128xf32, #tpu.memory_space<vmem>>, %arg22: memref<2x32xf32, #tpu.memory_space<vmem>>, %arg23: memref<16x32xf32, #tpu.memory_space<vmem>>) attributes {dimension_semantics = [#tpu.dimension_semantics<arbitrary>], iteration_bounds = array<i64: 2>, scalar_prefetch = 0 : i64, scratch_operands = 1 : i64, tpu.core_type = #tpu.core_type<tc>, window_params = [{pipeline_mode = #tpu.pipeline_mode<synchronous>, transform_indices = @transform_0, window_bounds = array<i64: 16, 32>}, {pipeline_mode = #tpu.pipeline_mode<synchronous>, transform_indices = @transform_1, window_bounds = array<i64: 2, 1, 8>}, {pipeline_mode = #tpu.pipeline_mode<synchronous>, transform_indices = @transform_2, window_bounds = array<i64: 1, 32>}, {pipeline_mode = #tpu.pipeline_mode<synchronous>, transform_indices = @transform_3, window_bounds = array<i64: 1, 32>}, {transform_indices = @transform_4, window_bounds = array<i64: 1, 32, 96>}, {transform_indices = @transform_5, window_bounds = array<i64: 1, 1, 96>}, {transform_indices = @transform_6, window_bounds = array<i64: 1, 32, 32>}, {transform_indices = @transform_7, window_bounds = array<i64: 1, 1, 32>}, {transform_indices = @transform_8, window_bounds = array<i64: 1, 1, 32>}, {transform_indices = @transform_9, window_bounds = array<i64: 1, 1, 32>}, {transform_indices = @transform_10, window_bounds = array<i64: 1, 32, 64>}, {transform_indices = @transform_11, window_bounds = array<i64: 1, 1, 64>}, {transform_indices = @transform_12, window_bounds = array<i64: 1, 64, 32>}, {transform_indices = @transform_13, window_bounds = array<i64: 1, 1, 32>}, {transform_indices = @transform_14, window_bounds = array<i64: 1, 1, 32>}, {transform_indices = @transform_15, window_bounds = array<i64: 1, 1, 32>}, {pipeline_mode = #tpu.pipeline_mode<synchronous>, transform_indices = @transform_16, window_bounds = array<i64: 32, 32>}, {pipeline_mode = #tpu.pipeline_mode<synchronous>, transform_indices = @transform_17, window_bounds = array<i64: 1, 32>}, {pipeline_mode = #tpu.pipeline_mode<synchronous>, transform_indices = @transform_18, window_bounds = array<i64: 32, 128>}, {pipeline_mode = #tpu.pipeline_mode<synchronous>, transform_indices = @transform_19, window_bounds = array<i64: 1, 128>}, {pipeline_mode = #tpu.pipeline_mode<synchronous>, transform_indices = @transform_20, window_bounds = array<i64: 2, 128>}, {pipeline_mode = #tpu.pipeline_mode<synchronous>, transform_indices = @transform_21, window_bounds = array<i64: 2, 32>}]} {
    %c0_i32 = arith.constant 0 : i32
    %0 = arith.cmpi eq, %arg0, %c0_i32 : i32
    %1 = arith.extui %0 : i1 to i32
    %c0_i32_0 = arith.constant 0 : i32
    %2 = arith.cmpi ne, %1, %c0_i32_0 : i32
    scf.if %2 {
      %c0_94 = arith.constant 0 : index
      %c0_95 = arith.constant 0 : index
      %214 = vector.load %arg1[%c0_94, %c0_95] : memref<16x32xf32, #tpu.memory_space<vmem>>, vector<16x32xf32>
      %c0_96 = arith.constant 0 : index
      %c0_97 = arith.constant 0 : index
      %215 = vector.load %arg3[%c0_96, %c0_97] : memref<1x32xf32, #tpu.memory_space<vmem>>, vector<1x32xf32>
      %c0_98 = arith.constant 0 : index
      %c0_99 = arith.constant 0 : index
      %216 = vector.load %arg4[%c0_98, %c0_99] : memref<1x32xf32, #tpu.memory_space<vmem>>, vector<1x32xf32>
      %cst_100 = arith.constant dense<0.000000e+00> : vector<16xf32>
      %217 = vector.multi_reduction <add>, %214, %cst_100 [1] : vector<16x32xf32> to vector<16xf32>
      %218 = vector.shape_cast %217 : vector<16xf32> to vector<16x1xf32>
      %cst_101 = arith.constant 3.200000e+01 : f32
      %219 = vector.broadcast %cst_101 : f32 to vector<16x1xf32>
      %220 = arith.divf %218, %219 : vector<16x1xf32>
      %221 = vector.broadcast %220 : vector<16x1xf32> to vector<16x32xf32>
      %222 = arith.subf %214, %221 : vector<16x32xf32>
      %223 = arith.mulf %222, %222 : vector<16x32xf32>
      %cst_102 = arith.constant dense<0.000000e+00> : vector<16xf32>
      %224 = vector.multi_reduction <add>, %223, %cst_102 [1] : vector<16x32xf32> to vector<16xf32>
      %225 = vector.shape_cast %224 : vector<16xf32> to vector<16x1xf32>
      %cst_103 = arith.constant 3.200000e+01 : f32
      %226 = vector.broadcast %cst_103 : f32 to vector<16x1xf32>
      %227 = arith.divf %225, %226 : vector<16x1xf32>
      %228 = vector.broadcast %220 : vector<16x1xf32> to vector<16x32xf32>
      %229 = arith.subf %214, %228 : vector<16x32xf32>
      %cst_104 = arith.constant 9.99999974E-6 : f32
      %230 = vector.broadcast %cst_104 : f32 to vector<16x1xf32>
      %231 = arith.addf %227, %230 : vector<16x1xf32>
      %232 = math.rsqrt %231 : vector<16x1xf32>
      %233 = vector.broadcast %232 : vector<16x1xf32> to vector<16x32xf32>
      %234 = arith.mulf %229, %233 : vector<16x32xf32>
      %235 = vector.broadcast %215 : vector<1x32xf32> to vector<16x32xf32>
      %236 = arith.mulf %234, %235 : vector<16x32xf32>
      %237 = vector.broadcast %216 : vector<1x32xf32> to vector<16x32xf32>
      %238 = arith.addf %236, %237 : vector<16x32xf32>
      %c0_105 = arith.constant 0 : index
      %c0_106 = arith.constant 0 : index
      %239 = vector.load %arg23[%c0_105, %c0_106] : memref<16x32xf32, #tpu.memory_space<vmem>>, vector<16x32xf32>
      tpu.vector_store %arg23[%c0_105, %c0_106], %238 {strides = array<i32>} : memref<16x32xf32, #tpu.memory_space<vmem>>, vector<16x32xf32>,
    } else {
    }
    %c0 = arith.constant 0 : index
    %c0_1 = arith.constant 0 : index
    %3 = vector.load %arg23[%c0, %c0_1] : memref<16x32xf32, #tpu.memory_space<vmem>>, vector<16x32xf32>
    %c0_2 = arith.constant 0 : index
    %c0_3 = arith.constant 0 : index
    %c0_4 = arith.constant 0 : index
    %4 = vector.load %arg5[%c0_2, %c0_3, %c0_4] : memref<1x32x96xf32, #tpu.memory_space<vmem>>, vector<1x32x96xf32>
    %5 = vector.shape_cast %4 : vector<1x32x96xf32> to vector<32x96xf32>
    %cst = arith.constant dense<0.000000e+00> : vector<16x96xf32>
    %6 = tpu.matmul %3, %5, %cst {dimension_numbers = #tpu.dot_dimension_numbers<[1], [0], [0], [1], [0, 0, 1, 1], [], []>} : vector<16x32xf32>, vector<32x96xf32>, vector<16x96xf32> -> vector<16x96xf32>
    %c0_5 = arith.constant 0 : index
    %c0_6 = arith.constant 0 : index
    %c0_7 = arith.constant 0 : index
    %7 = vector.load %arg6[%c0_5, %c0_6, %c0_7] : memref<1x1x96xf32, #tpu.memory_space<vmem>>, vector<1x1x96xf32>
    %8 = vector.shape_cast %7 : vector<1x1x96xf32> to vector<1x96xf32>
    %9 = vector.broadcast %8 : vector<1x96xf32> to vector<16x96xf32>
    %10 = arith.addf %6, %9 : vector<16x96xf32>
    %c0_8 = arith.constant 0 : index
    %c0_9 = arith.constant 0 : index
    %c0_10 = arith.constant 0 : index
    %11 = vector.load %arg2[%c0_8, %c0_9, %c0_10] : memref<2x1x8xf32, #tpu.memory_space<vmem>>, vector<2x1x8xf32>
    %cst_11 = arith.constant 0.000000e+00 : f32
    %12 = vector.broadcast %cst_11 : f32 to vector<16x32xf32>
    %13 = vector.extract_strided_slice %10 {offsets = [0, 0], sizes = [16, 8], strides = [1, 1]} : vector<16x96xf32> to vector<16x8xf32>
    %14 = vector.shape_cast %13 : vector<16x8xf32> to vector<2x8x8xf32>
    %15 = vector.extract_strided_slice %10 {offsets = [0, 32], sizes = [16, 8], strides = [1, 1]} : vector<16x96xf32> to vector<16x8xf32>
    %16 = vector.shape_cast %15 : vector<16x8xf32> to vector<2x8x8xf32>
    %17 = vector.extract_strided_slice %10 {offsets = [0, 64], sizes = [16, 8], strides = [1, 1]} : vector<16x96xf32> to vector<16x8xf32>
    %18 = vector.shape_cast %17 : vector<16x8xf32> to vector<2x8x8xf32>
    "tpu.trace_start"() <{level = 10 : i32, message = "bqd,bkd->bqk"}> : () -> ()
    %cst_12 = arith.constant dense<0.000000e+00> : vector<2x8x8xf32>
    %19 = tpu.matmul %14, %16, %cst_12 {dimension_numbers = #tpu.dot_dimension_numbers<[2], [2], [1], [1], [0, 0, 0, 1, 1, 1], [0], [0]>} : vector<2x8x8xf32>, vector<2x8x8xf32>, vector<2x8x8xf32> -> vector<2x8x8xf32>
    "tpu.trace_stop"() : () -> ()
    %cst_13 = arith.constant 0.353553385 : f32
    %20 = vector.broadcast %cst_13 : f32 to vector<2x8x8xf32>
    %21 = arith.mulf %19, %20 : vector<2x8x8xf32>
    %22 = vector.broadcast %11 : vector<2x1x8xf32> to vector<2x8x8xf32>
    %23 = arith.addf %21, %22 : vector<2x8x8xf32>
    %cst_14 = arith.constant dense<0xFF800000> : vector<2x8xf32>
    %24 = vector.multi_reduction <maximumf>, %23, %cst_14 [2] : vector<2x8x8xf32> to vector<2x8xf32>
    %25 = vector.shape_cast %24 : vector<2x8xf32> to vector<2x8x1xf32>
    %26 = vector.broadcast %25 : vector<2x8x1xf32> to vector<2x8x8xf32>
    %27 = arith.subf %23, %26 : vector<2x8x8xf32>
    %28 = math.exp %27 : vector<2x8x8xf32>
    %cst_15 = arith.constant dense<0.000000e+00> : vector<2x8xf32>
    %29 = vector.multi_reduction <add>, %28, %cst_15 [2] : vector<2x8x8xf32> to vector<2x8xf32>
    %30 = vector.shape_cast %29 : vector<2x8xf32> to vector<2x8x1xf32>
    %31 = tpu.reciprocal %30 {approx = true} : vector<2x8x1xf32> -> vector<2x8x1xf32>
    %32 = vector.broadcast %31 : vector<2x8x1xf32> to vector<2x8x8xf32>
    %33 = arith.mulf %28, %32 : vector<2x8x8xf32>
    "tpu.trace_start"() <{level = 10 : i32, message = "bqk,bkd->bqd"}> : () -> ()
    %cst_16 = arith.constant dense<0.000000e+00> : vector<2x8x8xf32>
    %34 = tpu.matmul %33, %18, %cst_16 {dimension_numbers = #tpu.dot_dimension_numbers<[2], [1], [1], [2], [0, 0, 0, 1, 1, 2], [0], [0]>} : vector<2x8x8xf32>, vector<2x8x8xf32>, vector<2x8x8xf32> -> vector<2x8x8xf32>
    "tpu.trace_stop"() : () -> ()
    %35 = vector.shape_cast %34 : vector<2x8x8xf32> to vector<16x8xf32>
    %c0_17 = arith.constant 0 : index
    %c0_18 = arith.constant 0 : index
    %c0_19 = arith.constant 0 : index
    %36 = vector.load %arg7[%c0_17, %c0_18, %c0_19] : memref<1x32x32xf32, #tpu.memory_space<vmem>>, vector<1x32x32xf32>
    %37 = vector.shape_cast %36 : vector<1x32x32xf32> to vector<32x32xf32>
    %38 = vector.extract_strided_slice %37 {offsets = [0, 0], sizes = [8, 32], strides = [1, 1]} : vector<32x32xf32> to vector<8x32xf32>
    %cst_20 = arith.constant dense<0.000000e+00> : vector<16x32xf32>
    %39 = tpu.matmul %35, %38, %cst_20 {dimension_numbers = #tpu.dot_dimension_numbers<[1], [0], [0], [1], [0, 0, 1, 1], [], []>} : vector<16x8xf32>, vector<8x32xf32>, vector<16x32xf32> -> vector<16x32xf32>
    %40 = arith.addf %12, %39 : vector<16x32xf32>
    %41 = vector.extract_strided_slice %10 {offsets = [0, 8], sizes = [16, 8], strides = [1, 1]} : vector<16x96xf32> to vector<16x8xf32>
    %42 = vector.shape_cast %41 : vector<16x8xf32> to vector<2x8x8xf32>
    %43 = vector.extract_strided_slice %10 {offsets = [0, 40], sizes = [16, 8], strides = [1, 1]} : vector<16x96xf32> to vector<16x8xf32>
    %44 = vector.shape_cast %43 : vector<16x8xf32> to vector<2x8x8xf32>
    %45 = vector.extract_strided_slice %10 {offsets = [0, 72], sizes = [16, 8], strides = [1, 1]} : vector<16x96xf32> to vector<16x8xf32>
    %46 = vector.shape_cast %45 : vector<16x8xf32> to vector<2x8x8xf32>
    "tpu.trace_start"() <{level = 10 : i32, message = "bqd,bkd->bqk"}> : () -> ()
    %cst_21 = arith.constant dense<0.000000e+00> : vector<2x8x8xf32>
    %47 = tpu.matmul %42, %44, %cst_21 {dimension_numbers = #tpu.dot_dimension_numbers<[2], [2], [1], [1], [0, 0, 0, 1, 1, 1], [0], [0]>} : vector<2x8x8xf32>, vector<2x8x8xf32>, vector<2x8x8xf32> -> vector<2x8x8xf32>
    "tpu.trace_stop"() : () -> ()
    %cst_22 = arith.constant 0.353553385 : f32
    %48 = vector.broadcast %cst_22 : f32 to vector<2x8x8xf32>
    %49 = arith.mulf %47, %48 : vector<2x8x8xf32>
    %50 = vector.broadcast %11 : vector<2x1x8xf32> to vector<2x8x8xf32>
    %51 = arith.addf %49, %50 : vector<2x8x8xf32>
    %cst_23 = arith.constant dense<0xFF800000> : vector<2x8xf32>
    %52 = vector.multi_reduction <maximumf>, %51, %cst_23 [2] : vector<2x8x8xf32> to vector<2x8xf32>
    %53 = vector.shape_cast %52 : vector<2x8xf32> to vector<2x8x1xf32>
    %54 = vector.broadcast %53 : vector<2x8x1xf32> to vector<2x8x8xf32>
    %55 = arith.subf %51, %54 : vector<2x8x8xf32>
    %56 = math.exp %55 : vector<2x8x8xf32>
    %cst_24 = arith.constant dense<0.000000e+00> : vector<2x8xf32>
    %57 = vector.multi_reduction <add>, %56, %cst_24 [2] : vector<2x8x8xf32> to vector<2x8xf32>
    %58 = vector.shape_cast %57 : vector<2x8xf32> to vector<2x8x1xf32>
    %59 = tpu.reciprocal %58 {approx = true} : vector<2x8x1xf32> -> vector<2x8x1xf32>
    %60 = vector.broadcast %59 : vector<2x8x1xf32> to vector<2x8x8xf32>
    %61 = arith.mulf %56, %60 : vector<2x8x8xf32>
    "tpu.trace_start"() <{level = 10 : i32, message = "bqk,bkd->bqd"}> : () -> ()
    %cst_25 = arith.constant dense<0.000000e+00> : vector<2x8x8xf32>
    %62 = tpu.matmul %61, %46, %cst_25 {dimension_numbers = #tpu.dot_dimension_numbers<[2], [1], [1], [2], [0, 0, 0, 1, 1, 2], [0], [0]>} : vector<2x8x8xf32>, vector<2x8x8xf32>, vector<2x8x8xf32> -> vector<2x8x8xf32>
    "tpu.trace_stop"() : () -> ()
    %63 = vector.shape_cast %62 : vector<2x8x8xf32> to vector<16x8xf32>
    %c0_26 = arith.constant 0 : index
    %c0_27 = arith.constant 0 : index
    %c0_28 = arith.constant 0 : index
    %64 = vector.load %arg7[%c0_26, %c0_27, %c0_28] : memref<1x32x32xf32, #tpu.memory_space<vmem>>, vector<1x32x32xf32>
    %65 = vector.shape_cast %64 : vector<1x32x32xf32> to vector<32x32xf32>
    %66 = vector.extract_strided_slice %65 {offsets = [8, 0], sizes = [8, 32], strides = [1, 1]} : vector<32x32xf32> to vector<8x32xf32>
    %cst_29 = arith.constant dense<0.000000e+00> : vector<16x32xf32>
    %67 = tpu.matmul %63, %66, %cst_29 {dimension_numbers = #tpu.dot_dimension_numbers<[1], [0], [0], [1], [0, 0, 1, 1], [], []>} : vector<16x8xf32>, vector<8x32xf32>, vector<16x32xf32> -> vector<16x32xf32>
    %68 = arith.addf %40, %67 : vector<16x32xf32>
    %69 = vector.extract_strided_slice %10 {offsets = [0, 16], sizes = [16, 8], strides = [1, 1]} : vector<16x96xf32> to vector<16x8xf32>
    %70 = vector.shape_cast %69 : vector<16x8xf32> to vector<2x8x8xf32>
    %71 = vector.extract_strided_slice %10 {offsets = [0, 48], sizes = [16, 8], strides = [1, 1]} : vector<16x96xf32> to vector<16x8xf32>
    %72 = vector.shape_cast %71 : vector<16x8xf32> to vector<2x8x8xf32>
    %73 = vector.extract_strided_slice %10 {offsets = [0, 80], sizes = [16, 8], strides = [1, 1]} : vector<16x96xf32> to vector<16x8xf32>
    %74 = vector.shape_cast %73 : vector<16x8xf32> to vector<2x8x8xf32>
    "tpu.trace_start"() <{level = 10 : i32, message = "bqd,bkd->bqk"}> : () -> ()
    %cst_30 = arith.constant dense<0.000000e+00> : vector<2x8x8xf32>
    %75 = tpu.matmul %70, %72, %cst_30 {dimension_numbers = #tpu.dot_dimension_numbers<[2], [2], [1], [1], [0, 0, 0, 1, 1, 1], [0], [0]>} : vector<2x8x8xf32>, vector<2x8x8xf32>, vector<2x8x8xf32> -> vector<2x8x8xf32>
    "tpu.trace_stop"() : () -> ()
    %cst_31 = arith.constant 0.353553385 : f32
    %76 = vector.broadcast %cst_31 : f32 to vector<2x8x8xf32>
    %77 = arith.mulf %75, %76 : vector<2x8x8xf32>
    %78 = vector.broadcast %11 : vector<2x1x8xf32> to vector<2x8x8xf32>
    %79 = arith.addf %77, %78 : vector<2x8x8xf32>
    %cst_32 = arith.constant dense<0xFF800000> : vector<2x8xf32>
    %80 = vector.multi_reduction <maximumf>, %79, %cst_32 [2] : vector<2x8x8xf32> to vector<2x8xf32>
    %81 = vector.shape_cast %80 : vector<2x8xf32> to vector<2x8x1xf32>
    %82 = vector.broadcast %81 : vector<2x8x1xf32> to vector<2x8x8xf32>
    %83 = arith.subf %79, %82 : vector<2x8x8xf32>
    %84 = math.exp %83 : vector<2x8x8xf32>
    %cst_33 = arith.constant dense<0.000000e+00> : vector<2x8xf32>
    %85 = vector.multi_reduction <add>, %84, %cst_33 [2] : vector<2x8x8xf32> to vector<2x8xf32>
    %86 = vector.shape_cast %85 : vector<2x8xf32> to vector<2x8x1xf32>
    %87 = tpu.reciprocal %86 {approx = true} : vector<2x8x1xf32> -> vector<2x8x1xf32>
    %88 = vector.broadcast %87 : vector<2x8x1xf32> to vector<2x8x8xf32>
    %89 = arith.mulf %84, %88 : vector<2x8x8xf32>
    "tpu.trace_start"() <{level = 10 : i32, message = "bqk,bkd->bqd"}> : () -> ()
    %cst_34 = arith.constant dense<0.000000e+00> : vector<2x8x8xf32>
    %90 = tpu.matmul %89, %74, %cst_34 {dimension_numbers = #tpu.dot_dimension_numbers<[2], [1], [1], [2], [0, 0, 0, 1, 1, 2], [0], [0]>} : vector<2x8x8xf32>, vector<2x8x8xf32>, vector<2x8x8xf32> -> vector<2x8x8xf32>
    "tpu.trace_stop"() : () -> ()
    %91 = vector.shape_cast %90 : vector<2x8x8xf32> to vector<16x8xf32>
    %c0_35 = arith.constant 0 : index
    %c0_36 = arith.constant 0 : index
    %c0_37 = arith.constant 0 : index
    %92 = vector.load %arg7[%c0_35, %c0_36, %c0_37] : memref<1x32x32xf32, #tpu.memory_space<vmem>>, vector<1x32x32xf32>
    %93 = vector.shape_cast %92 : vector<1x32x32xf32> to vector<32x32xf32>
    %94 = vector.extract_strided_slice %93 {offsets = [16, 0], sizes = [8, 32], strides = [1, 1]} : vector<32x32xf32> to vector<8x32xf32>
    %cst_38 = arith.constant dense<0.000000e+00> : vector<16x32xf32>
    %95 = tpu.matmul %91, %94, %cst_38 {dimension_numbers = #tpu.dot_dimension_numbers<[1], [0], [0], [1], [0, 0, 1, 1], [], []>} : vector<16x8xf32>, vector<8x32xf32>, vector<16x32xf32> -> vector<16x32xf32>
    %96 = arith.addf %68, %95 : vector<16x32xf32>
    %97 = vector.extract_strided_slice %10 {offsets = [0, 24], sizes = [16, 8], strides = [1, 1]} : vector<16x96xf32> to vector<16x8xf32>
    %98 = vector.shape_cast %97 : vector<16x8xf32> to vector<2x8x8xf32>
    %99 = vector.extract_strided_slice %10 {offsets = [0, 56], sizes = [16, 8], strides = [1, 1]} : vector<16x96xf32> to vector<16x8xf32>
    %100 = vector.shape_cast %99 : vector<16x8xf32> to vector<2x8x8xf32>
    %101 = vector.extract_strided_slice %10 {offsets = [0, 88], sizes = [16, 8], strides = [1, 1]} : vector<16x96xf32> to vector<16x8xf32>
    %102 = vector.shape_cast %101 : vector<16x8xf32> to vector<2x8x8xf32>
    "tpu.trace_start"() <{level = 10 : i32, message = "bqd,bkd->bqk"}> : () -> ()
    %cst_39 = arith.constant dense<0.000000e+00> : vector<2x8x8xf32>
    %103 = tpu.matmul %98, %100, %cst_39 {dimension_numbers = #tpu.dot_dimension_numbers<[2], [2], [1], [1], [0, 0, 0, 1, 1, 1], [0], [0]>} : vector<2x8x8xf32>, vector<2x8x8xf32>, vector<2x8x8xf32> -> vector<2x8x8xf32>
    "tpu.trace_stop"() : () -> ()
    %cst_40 = arith.constant 0.353553385 : f32
    %104 = vector.broadcast %cst_40 : f32 to vector<2x8x8xf32>
    %105 = arith.mulf %103, %104 : vector<2x8x8xf32>
    %106 = vector.broadcast %11 : vector<2x1x8xf32> to vector<2x8x8xf32>
    %107 = arith.addf %105, %106 : vector<2x8x8xf32>
    %cst_41 = arith.constant dense<0xFF800000> : vector<2x8xf32>
    %108 = vector.multi_reduction <maximumf>, %107, %cst_41 [2] : vector<2x8x8xf32> to vector<2x8xf32>
    %109 = vector.shape_cast %108 : vector<2x8xf32> to vector<2x8x1xf32>
    %110 = vector.broadcast %109 : vector<2x8x1xf32> to vector<2x8x8xf32>
    %111 = arith.subf %107, %110 : vector<2x8x8xf32>
    %112 = math.exp %111 : vector<2x8x8xf32>
    %cst_42 = arith.constant dense<0.000000e+00> : vector<2x8xf32>
    %113 = vector.multi_reduction <add>, %112, %cst_42 [2] : vector<2x8x8xf32> to vector<2x8xf32>
    %114 = vector.shape_cast %113 : vector<2x8xf32> to vector<2x8x1xf32>
    %115 = tpu.reciprocal %114 {approx = true} : vector<2x8x1xf32> -> vector<2x8x1xf32>
    %116 = vector.broadcast %115 : vector<2x8x1xf32> to vector<2x8x8xf32>
    %117 = arith.mulf %112, %116 : vector<2x8x8xf32>
    "tpu.trace_start"() <{level = 10 : i32, message = "bqk,bkd->bqd"}> : () -> ()
    %cst_43 = arith.constant dense<0.000000e+00> : vector<2x8x8xf32>
    %118 = tpu.matmul %117, %102, %cst_43 {dimension_numbers = #tpu.dot_dimension_numbers<[2], [1], [1], [2], [0, 0, 0, 1, 1, 2], [0], [0]>} : vector<2x8x8xf32>, vector<2x8x8xf32>, vector<2x8x8xf32> -> vector<2x8x8xf32>
    "tpu.trace_stop"() : () -> ()
    %119 = vector.shape_cast %118 : vector<2x8x8xf32> to vector<16x8xf32>
    %c0_44 = arith.constant 0 : index
    %c0_45 = arith.constant 0 : index
    %c0_46 = arith.constant 0 : index
    %120 = vector.load %arg7[%c0_44, %c0_45, %c0_46] : memref<1x32x32xf32, #tpu.memory_space<vmem>>, vector<1x32x32xf32>
    %121 = vector.shape_cast %120 : vector<1x32x32xf32> to vector<32x32xf32>
    %122 = vector.extract_strided_slice %121 {offsets = [24, 0], sizes = [8, 32], strides = [1, 1]} : vector<32x32xf32> to vector<8x32xf32>
    %cst_47 = arith.constant dense<0.000000e+00> : vector<16x32xf32>
    %123 = tpu.matmul %119, %122, %cst_47 {dimension_numbers = #tpu.dot_dimension_numbers<[1], [0], [0], [1], [0, 0, 1, 1], [], []>} : vector<16x8xf32>, vector<8x32xf32>, vector<16x32xf32> -> vector<16x32xf32>
    %124 = arith.addf %96, %123 : vector<16x32xf32>
    %c0_48 = arith.constant 0 : index
    %c0_49 = arith.constant 0 : index
    %c0_50 = arith.constant 0 : index
    %125 = vector.load %arg8[%c0_48, %c0_49, %c0_50] : memref<1x1x32xf32, #tpu.memory_space<vmem>>, vector<1x1x32xf32>
    %126 = vector.shape_cast %125 : vector<1x1x32xf32> to vector<1x32xf32>
    %127 = vector.broadcast %126 : vector<1x32xf32> to vector<16x32xf32>
    %128 = arith.addf %124, %127 : vector<16x32xf32>
    %129 = arith.addf %3, %128 : vector<16x32xf32>
    %c0_51 = arith.constant 0 : index
    %c0_52 = arith.constant 0 : index
    %c0_53 = arith.constant 0 : index
    %130 = vector.load %arg9[%c0_51, %c0_52, %c0_53] : memref<1x1x32xf32, #tpu.memory_space<vmem>>, vector<1x1x32xf32>
    %131 = vector.shape_cast %130 : vector<1x1x32xf32> to vector<1x32xf32>
    %c0_54 = arith.constant 0 : index
    %c0_55 = arith.constant 0 : index
    %c0_56 = arith.constant 0 : index
    %132 = vector.load %arg10[%c0_54, %c0_55, %c0_56] : memref<1x1x32xf32, #tpu.memory_space<vmem>>, vector<1x1x32xf32>
    %133 = vector.shape_cast %132 : vector<1x1x32xf32> to vector<1x32xf32>
    %cst_57 = arith.constant dense<0.000000e+00> : vector<16xf32>
    %134 = vector.multi_reduction <add>, %129, %cst_57 [1] : vector<16x32xf32> to vector<16xf32>
    %135 = vector.shape_cast %134 : vector<16xf32> to vector<16x1xf32>
    %cst_58 = arith.constant 3.200000e+01 : f32
    %136 = vector.broadcast %cst_58 : f32 to vector<16x1xf32>
    %137 = arith.divf %135, %136 : vector<16x1xf32>
    %138 = vector.broadcast %137 : vector<16x1xf32> to vector<16x32xf32>
    %139 = arith.subf %129, %138 : vector<16x32xf32>
    %140 = arith.mulf %139, %139 : vector<16x32xf32>
    %cst_59 = arith.constant dense<0.000000e+00> : vector<16xf32>
    %141 = vector.multi_reduction <add>, %140, %cst_59 [1] : vector<16x32xf32> to vector<16xf32>
    %142 = vector.shape_cast %141 : vector<16xf32> to vector<16x1xf32>
    %cst_60 = arith.constant 3.200000e+01 : f32
    %143 = vector.broadcast %cst_60 : f32 to vector<16x1xf32>
    %144 = arith.divf %142, %143 : vector<16x1xf32>
    %145 = vector.broadcast %137 : vector<16x1xf32> to vector<16x32xf32>
    %146 = arith.subf %129, %145 : vector<16x32xf32>
    %cst_61 = arith.constant 9.99999974E-6 : f32
    %147 = vector.broadcast %cst_61 : f32 to vector<16x1xf32>
    %148 = arith.addf %144, %147 : vector<16x1xf32>
    %149 = math.rsqrt %148 : vector<16x1xf32>
    %150 = vector.broadcast %149 : vector<16x1xf32> to vector<16x32xf32>
    %151 = arith.mulf %146, %150 : vector<16x32xf32>
    %152 = vector.broadcast %131 : vector<1x32xf32> to vector<16x32xf32>
    %153 = arith.mulf %151, %152 : vector<16x32xf32>
    %154 = vector.broadcast %133 : vector<1x32xf32> to vector<16x32xf32>
    %155 = arith.addf %153, %154 : vector<16x32xf32>
    %c0_62 = arith.constant 0 : index
    %c0_63 = arith.constant 0 : index
    %c0_64 = arith.constant 0 : index
    %156 = vector.load %arg11[%c0_62, %c0_63, %c0_64] : memref<1x32x64xf32, #tpu.memory_space<vmem>>, vector<1x32x64xf32>
    %157 = vector.shape_cast %156 : vector<1x32x64xf32> to vector<32x64xf32>
    %cst_65 = arith.constant dense<0.000000e+00> : vector<16x64xf32>
    %158 = tpu.matmul %155, %157, %cst_65 {dimension_numbers = #tpu.dot_dimension_numbers<[1], [0], [0], [1], [0, 0, 1, 1], [], []>} : vector<16x32xf32>, vector<32x64xf32>, vector<16x64xf32> -> vector<16x64xf32>
    %c0_66 = arith.constant 0 : index
    %c0_67 = arith.constant 0 : index
    %c0_68 = arith.constant 0 : index
    %159 = vector.load %arg12[%c0_66, %c0_67, %c0_68] : memref<1x1x64xf32, #tpu.memory_space<vmem>>, vector<1x1x64xf32>
    %160 = vector.shape_cast %159 : vector<1x1x64xf32> to vector<1x64xf32>
    %161 = vector.broadcast %160 : vector<1x64xf32> to vector<16x64xf32>
    %162 = arith.addf %158, %161 : vector<16x64xf32>
    %163 = arith.mulf %162, %162 : vector<16x64xf32>
    %164 = arith.mulf %162, %163 : vector<16x64xf32>
    %cst_69 = arith.constant 4.471500e-02 : f32
    %165 = vector.broadcast %cst_69 : f32 to vector<16x64xf32>
    %166 = arith.mulf %165, %164 : vector<16x64xf32>
    %167 = arith.addf %162, %166 : vector<16x64xf32>
    %cst_70 = arith.constant 0.797884583 : f32
    %168 = vector.broadcast %cst_70 : f32 to vector<16x64xf32>
    %169 = arith.mulf %168, %167 : vector<16x64xf32>
    %170 = math.tanh %169 : vector<16x64xf32>
    %cst_71 = arith.constant 1.000000e+00 : f32
    %171 = vector.broadcast %cst_71 : f32 to vector<16x64xf32>
    %172 = arith.addf %171, %170 : vector<16x64xf32>
    %cst_72 = arith.constant 5.000000e-01 : f32
    %173 = vector.broadcast %cst_72 : f32 to vector<16x64xf32>
    %174 = arith.mulf %173, %172 : vector<16x64xf32>
    %175 = arith.mulf %162, %174 : vector<16x64xf32>
    %c0_73 = arith.constant 0 : index
    %c0_74 = arith.constant 0 : index
    %c0_75 = arith.constant 0 : index
    %176 = vector.load %arg13[%c0_73, %c0_74, %c0_75] : memref<1x64x32xf32, #tpu.memory_space<vmem>>, vector<1x64x32xf32>
    %177 = vector.shape_cast %176 : vector<1x64x32xf32> to vector<64x32xf32>
    %cst_76 = arith.constant dense<0.000000e+00> : vector<16x32xf32>
    %178 = tpu.matmul %175, %177, %cst_76 {dimension_numbers = #tpu.dot_dimension_numbers<[1], [0], [0], [1], [0, 0, 1, 1], [], []>} : vector<16x64xf32>, vector<64x32xf32>, vector<16x32xf32> -> vector<16x32xf32>
    %c0_77 = arith.constant 0 : index
    %c0_78 = arith.constant 0 : index
    %c0_79 = arith.constant 0 : index
    %179 = vector.load %arg14[%c0_77, %c0_78, %c0_79] : memref<1x1x32xf32, #tpu.memory_space<vmem>>, vector<1x1x32xf32>
    %180 = vector.shape_cast %179 : vector<1x1x32xf32> to vector<1x32xf32>
    %181 = vector.broadcast %180 : vector<1x32xf32> to vector<16x32xf32>
    %182 = arith.addf %178, %181 : vector<16x32xf32>
    %183 = arith.addf %155, %182 : vector<16x32xf32>
    %c0_80 = arith.constant 0 : index
    %c0_81 = arith.constant 0 : index
    %c0_82 = arith.constant 0 : index
    %184 = vector.load %arg15[%c0_80, %c0_81, %c0_82] : memref<1x1x32xf32, #tpu.memory_space<vmem>>, vector<1x1x32xf32>
    %185 = vector.shape_cast %184 : vector<1x1x32xf32> to vector<1x32xf32>
    %c0_83 = arith.constant 0 : index
    %c0_84 = arith.constant 0 : index
    %c0_85 = arith.constant 0 : index
    %186 = vector.load %arg16[%c0_83, %c0_84, %c0_85] : memref<1x1x32xf32, #tpu.memory_space<vmem>>, vector<1x1x32xf32>
    %187 = vector.shape_cast %186 : vector<1x1x32xf32> to vector<1x32xf32>
    %cst_86 = arith.constant dense<0.000000e+00> : vector<16xf32>
    %188 = vector.multi_reduction <add>, %183, %cst_86 [1] : vector<16x32xf32> to vector<16xf32>
    %189 = vector.shape_cast %188 : vector<16xf32> to vector<16x1xf32>
    %cst_87 = arith.constant 3.200000e+01 : f32
    %190 = vector.broadcast %cst_87 : f32 to vector<16x1xf32>
    %191 = arith.divf %189, %190 : vector<16x1xf32>
    %192 = vector.broadcast %191 : vector<16x1xf32> to vector<16x32xf32>
    %193 = arith.subf %183, %192 : vector<16x32xf32>
    %194 = arith.mulf %193, %193 : vector<16x32xf32>
    %cst_88 = arith.constant dense<0.000000e+00> : vector<16xf32>
    %195 = vector.multi_reduction <add>, %194, %cst_88 [1] : vector<16x32xf32> to vector<16xf32>
    %196 = vector.shape_cast %195 : vector<16xf32> to vector<16x1xf32>
    %cst_89 = arith.constant 3.200000e+01 : f32
    %197 = vector.broadcast %cst_89 : f32 to vector<16x1xf32>
    %198 = arith.divf %196, %197 : vector<16x1xf32>
    %199 = vector.broadcast %191 : vector<16x1xf32> to vector<16x32xf32>
    %200 = arith.subf %183, %199 : vector<16x32xf32>
    %cst_90 = arith.constant 9.99999974E-6 : f32
    %201 = vector.broadcast %cst_90 : f32 to vector<16x1xf32>
    %202 = arith.addf %198, %201 : vector<16x1xf32>
    %203 = math.rsqrt %202 : vector<16x1xf32>
    %204 = vector.broadcast %203 : vector<16x1xf32> to vector<16x32xf32>
    %205 = arith.mulf %200, %204 : vector<16x32xf32>
    %206 = vector.broadcast %185 : vector<1x32xf32> to vector<16x32xf32>
    %207 = arith.mulf %205, %206 : vector<16x32xf32>
    %208 = vector.broadcast %187 : vector<1x32xf32> to vector<16x32xf32>
    %209 = arith.addf %207, %208 : vector<16x32xf32>
    %c0_91 = arith.constant 0 : index
    %c0_92 = arith.constant 0 : index
    %210 = vector.load %arg23[%c0_91, %c0_92] : memref<16x32xf32, #tpu.memory_space<vmem>>, vector<16x32xf32>
    tpu.vector_store %arg23[%c0_91, %c0_92], %209 {strides = array<i32>} : memref<16x32xf32, #tpu.memory_space<vmem>>, vector<16x32xf32>,
    %c1_i32 = arith.constant 1 : i32
    %211 = arith.cmpi eq, %arg0, %c1_i32 : i32
    %212 = arith.extui %211 : i1 to i32
    %c0_i32_93 = arith.constant 0 : i32
    %213 = arith.cmpi ne, %212, %c0_i32_93 : i32
    scf.if %213 {
      %214 = vector.shape_cast %209 : vector<16x32xf32> to vector<2x8x32xf32>
      %215 = vector.extract_strided_slice %214 {offsets = [0, 0, 0], sizes = [2, 1, 32], strides = [1, 1, 1]} : vector<2x8x32xf32> to vector<2x1x32xf32>
      %216 = vector.shape_cast %215 : vector<2x1x32xf32> to vector<2x32xf32>
      %c0_94 = arith.constant 0 : index
      %c0_95 = arith.constant 0 : index
      %217 = vector.load %arg17[%c0_94, %c0_95] : memref<32x32xf32, #tpu.memory_space<vmem>>, vector<32x32xf32>
      %cst_96 = arith.constant dense<0.000000e+00> : vector<2x32xf32>
      %218 = tpu.matmul %216, %217, %cst_96 {dimension_numbers = #tpu.dot_dimension_numbers<[1], [0], [0], [1], [0, 0, 1, 1], [], []>} : vector<2x32xf32>, vector<32x32xf32>, vector<2x32xf32> -> vector<2x32xf32>
      %c0_97 = arith.constant 0 : index
      %c0_98 = arith.constant 0 : index
      %219 = vector.load %arg18[%c0_97, %c0_98] : memref<1x32xf32, #tpu.memory_space<vmem>>, vector<1x32xf32>
      %220 = vector.broadcast %219 : vector<1x32xf32> to vector<2x32xf32>
      %221 = arith.addf %218, %220 : vector<2x32xf32>
      %222 = math.tanh %221 : vector<2x32xf32>
      %c0_99 = arith.constant 0 : index
      %c0_100 = arith.constant 0 : index
      %223 = vector.load %arg22[%c0_99, %c0_100] : memref<2x32xf32, #tpu.memory_space<vmem>>, vector<2x32xf32>
      tpu.vector_store %arg22[%c0_99, %c0_100], %222 {strides = array<i32>} : memref<2x32xf32, #tpu.memory_space<vmem>>, vector<2x32xf32>,
      %c0_101 = arith.constant 0 : index
      %c0_102 = arith.constant 0 : index
      %224 = vector.load %arg19[%c0_101, %c0_102] : memref<32x128xf32, #tpu.memory_space<vmem>>, vector<32x128xf32>
      %cst_103 = arith.constant dense<0.000000e+00> : vector<2x128xf32>
      %225 = tpu.matmul %222, %224, %cst_103 {dimension_numbers = #tpu.dot_dimension_numbers<[1], [0], [0], [1], [0, 0, 1, 1], [], []>} : vector<2x32xf32>, vector<32x128xf32>, vector<2x128xf32> -> vector<2x128xf32>
      %c0_104 = arith.constant 0 : index
      %c0_105 = arith.constant 0 : index
      %226 = vector.load %arg20[%c0_104, %c0_105] : memref<1x128xf32, #tpu.memory_space<vmem>>, vector<1x128xf32>
      %227 = vector.broadcast %226 : vector<1x128xf32> to vector<2x128xf32>
      %228 = arith.addf %225, %227 : vector<2x128xf32>
      %c0_106 = arith.constant 0 : index
      %c0_107 = arith.constant 0 : index
      %229 = vector.load %arg21[%c0_106, %c0_107] : memref<2x128xf32, #tpu.memory_space<vmem>>, vector<2x128xf32>
      tpu.vector_store %arg21[%c0_106, %c0_107], %228 {strides = array<i32>} : memref<2x128xf32, #tpu.memory_space<vmem>>, vector<2x128xf32>,
    } else {
    }
    return
  }
  func.func @transform_0(%arg0: i32) -> (i32, i32) {
    %c0_i32 = arith.constant 0 : i32
    %c0_i32_0 = arith.constant 0 : i32
    %c0_i32_1 = arith.constant 0 : i32
    return %c0_i32, %c0_i32_0 : i32, i32
  }
  func.func @transform_1(%arg0: i32) -> (i32, i32, i32) {
    %c0_i32 = arith.constant 0 : i32
    %c0_i32_0 = arith.constant 0 : i32
    %c0_i32_1 = arith.constant 0 : i32
    %c0_i32_2 = arith.constant 0 : i32
    return %c0_i32, %c0_i32_0, %c0_i32_1 : i32, i32, i32
  }
  func.func @transform_2(%arg0: i32) -> (i32, i32) {
    %c0_i32 = arith.constant 0 : i32
    %c0_i32_0 = arith.constant 0 : i32
    %c0_i32_1 = arith.constant 0 : i32
    return %c0_i32, %c0_i32_0 : i32, i32
  }
  func.func @transform_3(%arg0: i32) -> (i32, i32) {
    %c0_i32 = arith.constant 0 : i32
    %c0_i32_0 = arith.constant 0 : i32
    %c0_i32_1 = arith.constant 0 : i32
    return %c0_i32, %c0_i32_0 : i32, i32
  }
  func.func @transform_4(%arg0: i32) -> (i32, i32, i32) {
    %c0_i32 = arith.constant 0 : i32
    %c0_i32_0 = arith.constant 0 : i32
    %c0_i32_1 = arith.constant 0 : i32
    return %arg0, %c0_i32, %c0_i32_0 : i32, i32, i32
  }
  func.func @transform_5(%arg0: i32) -> (i32, i32, i32) {
    %c0_i32 = arith.constant 0 : i32
    %c0_i32_0 = arith.constant 0 : i32
    %c0_i32_1 = arith.constant 0 : i32
    return %arg0, %c0_i32, %c0_i32_0 : i32, i32, i32
  }
  func.func @transform_6(%arg0: i32) -> (i32, i32, i32) {
    %c0_i32 = arith.constant 0 : i32
    %c0_i32_0 = arith.constant 0 : i32
    %c0_i32_1 = arith.constant 0 : i32
    return %arg0, %c0_i32, %c0_i32_0 : i32, i32, i32
  }
  func.func @transform_7(%arg0: i32) -> (i32, i32, i32) {
    %c0_i32 = arith.constant 0 : i32
    %c0_i32_0 = arith.constant 0 : i32
    %c0_i32_1 = arith.constant 0 : i32
    return %arg0, %c0_i32, %c0_i32_0 : i32, i32, i32
  }
  func.func @transform_8(%arg0: i32) -> (i32, i32, i32) {
    %c0_i32 = arith.constant 0 : i32
    %c0_i32_0 = arith.constant 0 : i32
    %c0_i32_1 = arith.constant 0 : i32
    return %arg0, %c0_i32, %c0_i32_0 : i32, i32, i32
  }
  func.func @transform_9(%arg0: i32) -> (i32, i32, i32) {
    %c0_i32 = arith.constant 0 : i32
    %c0_i32_0 = arith.constant 0 : i32
    %c0_i32_1 = arith.constant 0 : i32
    return %arg0, %c0_i32, %c0_i32_0 : i32, i32, i32
  }
  func.func @transform_10(%arg0: i32) -> (i32, i32, i32) {
    %c0_i32 = arith.constant 0 : i32
    %c0_i32_0 = arith.constant 0 : i32
    %c0_i32_1 = arith.constant 0 : i32
    return %arg0, %c0_i32, %c0_i32_0 : i32, i32, i32
  }
  func.func @transform_11(%arg0: i32) -> (i32, i32, i32) {
    %c0_i32 = arith.constant 0 : i32
    %c0_i32_0 = arith.constant 0 : i32
    %c0_i32_1 = arith.constant 0 : i32
    return %arg0, %c0_i32, %c0_i32_0 : i32, i32, i32
  }
  func.func @transform_12(%arg0: i32) -> (i32, i32, i32) {
    %c0_i32 = arith.constant 0 : i32
    %c0_i32_0 = arith.constant 0 : i32
    %c0_i32_1 = arith.constant 0 : i32
    return %arg0, %c0_i32, %c0_i32_0 : i32, i32, i32
  }
  func.func @transform_13(%arg0: i32) -> (i32, i32, i32) {
    %c0_i32 = arith.constant 0 : i32
    %c0_i32_0 = arith.constant 0 : i32
    %c0_i32_1 = arith.constant 0 : i32
    return %arg0, %c0_i32, %c0_i32_0 : i32, i32, i32
  }
  func.func @transform_14(%arg0: i32) -> (i32, i32, i32) {
    %c0_i32 = arith.constant 0 : i32
    %c0_i32_0 = arith.constant 0 : i32
    %c0_i32_1 = arith.constant 0 : i32
    return %arg0, %c0_i32, %c0_i32_0 : i32, i32, i32
  }
  func.func @transform_15(%arg0: i32) -> (i32, i32, i32) {
    %c0_i32 = arith.constant 0 : i32
    %c0_i32_0 = arith.constant 0 : i32
    %c0_i32_1 = arith.constant 0 : i32
    return %arg0, %c0_i32, %c0_i32_0 : i32, i32, i32
  }
  func.func @transform_16(%arg0: i32) -> (i32, i32) {
    %c0_i32 = arith.constant 0 : i32
    %c0_i32_0 = arith.constant 0 : i32
    %c0_i32_1 = arith.constant 0 : i32
    return %c0_i32, %c0_i32_0 : i32, i32
  }
  func.func @transform_17(%arg0: i32) -> (i32, i32) {
    %c0_i32 = arith.constant 0 : i32
    %c0_i32_0 = arith.constant 0 : i32
    %c0_i32_1 = arith.constant 0 : i32
    return %c0_i32, %c0_i32_0 : i32, i32
  }
  func.func @transform_18(%arg0: i32) -> (i32, i32) {
    %c0_i32 = arith.constant 0 : i32
    %c0_i32_0 = arith.constant 0 : i32
    %c0_i32_1 = arith.constant 0 : i32
    return %c0_i32, %c0_i32_0 : i32, i32
  }
  func.func @transform_19(%arg0: i32) -> (i32, i32) {
    %c0_i32 = arith.constant 0 : i32
    %c0_i32_0 = arith.constant 0 : i32
    %c0_i32_1 = arith.constant 0 : i32
    return %c0_i32, %c0_i32_0 : i32, i32
  }
  func.func @transform_20(%arg0: i32) -> (i32, i32) {
    %c0_i32 = arith.constant 0 : i32
    %c0_i32_0 = arith.constant 0 : i32
    %c0_i32_1 = arith.constant 0 : i32
    return %c0_i32, %c0_i32_0 : i32, i32
  }
  func.func @transform_21(%arg0: i32) -> (i32, i32) {
    %c0_i32 = arith.constant 0 : i32
    %c0_i32_0 = arith.constant 0 : i32
    %c0_i32_1 = arith.constant 0 : i32
    return %c0_i32, %c0_i32_0 : i32, i32
  }
}

</mosaic_0001>

<bundles_post_ra>
// kernel: emotion_classifier_forward.1
= control target key start
LH: loop header
LB: loop body
LE: loop exit
PB: predicated region body
PF: predicated region fallthrough
CT: control target
= control target key end

     0   :  { %s4589_s0 = inlined_call_operand.vmem [shape: f32[16,32], index: 0, kind: input, shape index: {}]   ;;  %s4590_s1 = inlined_call_operand.vmem [shape: f32[2,1,8], index: 1, kind: input, shape index: {}]   ;;  %s4591_s2 = inlined_call_operand.vmem [shape: f32[1,32], index: 2, kind: input, shape index: {}]   ;;  %s4592_s3 = inlined_call_operand.vmem [shape: f32[1,32], index: 3, kind: input, shape index: {}, may-alias: {3,17}]   ;;  %s4593_s4 = inlined_call_operand.vmem [shape: f32[2,32,96], index: 4, kind: input, shape index: {}]   ;;  %s4594_s5 = inlined_call_operand.vmem [shape: f32[2,1,96], index: 5, kind: input, shape index: {}]   ;;  %s4595_s6 = inlined_call_operand.vmem [shape: f32[2,32,32], index: 6, kind: input, shape index: {}]   ;;  %s4596_s7 = inlined_call_operand.vmem [shape: f32[2,1,32], index: 7, kind: input, shape index: {}, may-alias: {7,9,13,15}]   ;;  %s4597_s8 = inlined_call_operand.vmem [shape: f32[2,1,32], index: 8, kind: input, shape index: {}, may-alias: {8,14}]   ;;  %s4598_s9 = inlined_call_operand.vmem [shape: f32[2,1,32], index: 9, kind: input, shape index: {}, may-alias: {7,9,13,15}]   ;;  %s4599_s10 = inlined_call_operand.hbm [shape: f32[2,32,64], index: 10, kind: input, shape index: {}]   ;;  %s4600_s11 = inlined_call_operand.vmem [shape: f32[2,1,64], index: 11, kind: input, shape index: {}]   ;;  %s4601_s12 = inlined_call_operand.vmem [shape: f32[2,64,32], index: 12, kind: input, shape index: {}]   ;;  %s4602_s13 = inlined_call_operand.vmem [shape: f32[2,1,32], index: 13, kind: input, shape index: {}, may-alias: {7,9,13,15}]   ;;  %s4603_s14 = inlined_call_operand.vmem [shape: f32[2,1,32], index: 14, kind: input, shape index: {}, may-alias: {8,14}]   ;;  %s4604_s15 = inlined_call_operand.vmem [shape: f32[2,1,32], index: 15, kind: input, shape index: {}, may-alias: {7,9,13,15}]   ;;  %s4605_s16 = inlined_call_operand.hbm [shape: f32[32,32], index: 16, kind: input, shape index: {}]   ;;  %s4606_s17 = inlined_call_operand.vmem [shape: f32[1,32], index: 17, kind: input, shape index: {}, may-alias: {3,17}]   ;;  %s4607_s18 = inlined_call_operand.vmem [shape: f32[32,128], index: 18, kind: input, shape index: {}]   ;;  %s4608_s19 = inlined_call_operand.vmem [shape: f32[1,128], index: 19, kind: input, shape index: {}]   ;;  %s4609_s20 = inlined_call_operand.hbm [shape: f32[2,128], index: 20, kind: output, shape index: {0}]   ;;  %s4610_s21 = inlined_call_operand.hbm [shape: f32[2,32], index: 21, kind: output, shape index: {1}]  }
   0x1   :  { %4621 = sst [smem:[#allocation18_spill]] %s4589_s0 }
   0x2   :  { %4622 = sst [smem:[#allocation19_spill]] %s4590_s1 }
   0x3   :  { %4623 = sst [smem:[#allocation20_spill]] %s4591_s2 }
   0x4   :  { %4624 = sst [smem:[#allocation21_spill]] %s4592_s3 }
   0x5   :  { %4625 = sst [smem:[#allocation22_spill]] %s4593_s4 }
   0x6   :  { %4626 = sst [smem:[#allocation23_spill]] %s4594_s5 }
   0x7   :  { %4627 = sst [smem:[#allocation24_spill]] %s4595_s6 }
   0x8   :  { %4628 = sst [smem:[#allocation25_spill]] %s4599_s10 }
   0x9   :  { %4629 = sst [smem:[#allocation26_spill]] %s4605_s16 }
   0xa   :  { %4630 = sst [smem:[#allocation27_spill]] %s4606_s17 }
   0xb   :  { %4631 = sst [smem:[#allocation28_spill]] %s4607_s18 }
   0xc   :  { %4632 = sst [smem:[#allocation29_spill]] %s4608_s19 }
   0xd   :  { %4633 = sst [smem:[#allocation30_spill]] %s4609_s20 }
   0xe   :  { %4634 = sst [smem:[#allocation31_spill]] %s4610_s21 }
   0xf   :  { %27 = vsyncpa [#allocation4], 0 }
  0x10   :  { %29 = vsyncpa [#allocation4 + $0x1], 0 }
  0x11   :  { %30 = vsyncpa [#allocation7], 0 }
  0x12   :  { %31 = vsyncpa [#allocation5], 0 }
  0x13   :  { %32 = vsyncpa [#allocation10], 0  ;;  %s4100_s2 = smov 0   ;;  %s4102_s25 = smov 0  }
  0x14   :  { %s4104_s26 = smov 0   ;;  %s4106_s27 = smov 0  }
  0x15 LB: > { %4635 = sst [smem:[#allocation15_spill]] %s3963_s26  ;;  %s4119_s3 = sadd.s32 4294967295, %s3967_s27   ;;  %s3967_s27 = sphi %s4106_s27, %s4666_s27   ;;  %s3963_s26 = sphi %s4104_s26, %s4668_s26   ;;  %s3959_s25 = sphi %s4102_s25, %s4670_s25   ;;  %s3955_s2 = sphi %s4100_s2, %s4669_s2  }
  0x16   : > { %p298_p0 = scmp.ne.s32.totalorder %s3959_s25, %s3955_s2  ;;  %p4617_p1 = scmp.eq.s32.totalorder %s4119_s3, 0 }
  0x17   : > { %p3368_p2 = scmp.ge.s32.totalorder %s3967_s27, 1  ;;  %p565_p3 = scmp.lt.s32.totalorder %s3967_s27, 3 }
  0x18   : > { %p4128_p5 = por %p4617_p1, %p298_p0  ;;  %s3969_s0 = smov [#allocation6]  }
  0x19   : > { %p4132_p6 = pnand %p3368_p2, %p565_p3  ;;  %s589_s4 = sshll.u32 %s3969_s0, 4  ;;  %s590_s4 = int_to_ptr.vmem [resolvable:$true] %s589_s4 }
  0x1a   : > { %s4636_s28 = scalar_select %p4128_p5, 1, 0 }
  0x1b   : > { %s4637_s29 = scalar_select %p4132_p6, 1, 0 }
  0x1c   : > { %p3702_p7 = pneg %p4132_p6  ;;  %s4145_s5 = sadd.s32 1, %s3967_s27  }
  0x1d   : > { %4639 = sst [smem:[#allocation16_spill]] %s4145_s5  ;;  %s285_s22 = sadd.s32 1, %s3963_s26 }
  0x1e   : > { %p4140_p8 = pnand %p3702_p7, %p4617_p1  ;;  %s282_s23 = ssub.s32 %s3967_s27, %s4145_s5 }
  0x1f   : > { %s3830_s1 = scalar_lea.vmem %s590_s4, 512  ;;  %p3838_p13 = scmp.lt.s32.totalorder %s590_s4, %s590_s4 }
  0x20   : > { %p3821_p9 = pneg %p4140_p8  ;;  %p3831_p10 = scmp.ne.s32.totalorder %s590_s4, %s3830_s1 }
  0x21   : > { %p3839_p0 = scmp.lt.s32.totalorder %s3830_s1, %s3830_s1 }
  0x22   : > { %p3833_p11 = pnand %p3831_p10, %p3821_p9 }
  0x23   : > { %p3840_p2 = por %p3839_p0, %p3838_p13 }
  0x24   : > { %p3834_p12 = pneg %p3833_p11 }
  0x26   : > { %p3841_p3 = pnand %p3840_p2, %p3834_p12 }
  0x28   : > { %3844 = shalt.err (!%p3841_p3)
}
  0x29   : > { %s4616_s24 = smov 128   ;;  %s3971_s2 = smov 8  }
  0x2a   : > { %s4640_s16 = sld [smem:[#allocation26_spill]]  ;;  %p283_p7 = scmp.eq.s32.totalorder %s282_s23, 0 }
  0x2b   : > { %p292_p9 = scmp.ne.s32.totalorder %s3963_s26, %s3959_s25  ;;  %p293_p10 = scmp.eq.s32.totalorder %s3967_s27, 0 }
  0x2c   : > { %p3711_p11 = scmp.lt.s32.totalorder %s3967_s27, 2  ;;  %s652_s21 = sand.u32 1, %s3963_s26  }
  0x2d   : > { %s4165_s1 = scalar_select %p283_p7, %s3963_s26, %s285_s22  }
  0x2e   : > { %p294_p12 = por %p293_p10, %p292_p9  ;;  %s3371_s20 = sshll.u32 %s652_s21, 5 }
  0x2f   : > { %4641 = sst [smem:[#allocation17_spill]] %s4165_s1  ;;  %s3445_s19 = sshll.u32 %s3967_s27, 9 }
  0x30   : > { %3705 = dma.hbm_to_vmem [thread:$0]  (!%p4140_p8), %s4640_s16, 512, %s590_s4, [#allocation7], %s4616_s24, %s4616_s24, %s3971_s2  }
  0x31   : > { %s4642_s10 = sld [smem:[#allocation25_spill]]  ;;  %s656_s5 = scalar_lea.vmem [#allocation3], %s3371_s20 }
  0x32   : > { %s663_s4 = sshll.u32 %s656_s5, 4  ;;  %p4176_p8 = pnand %p3711_p11, %p294_p12  ;;  %s4174_s4 = int_to_ptr.vmem [resolvable:$true] %s663_s4 }
  0x33   : > { %s4180_s22 = scalar_lea.sflag [#allocation4], %s652_s21 }
  0x34   : > { %p3847_p0 = pneg %p4176_p8 }
  0x37   : > { %s4172_s30 = scalar_lea.hbm %s4642_s10, %s3445_s19  ;;  %s3850_s19 = scalar_lea.hbm %s4642_s10, 1024 }
  0x38   : > { %s3845_s27 = scalar_lea.hbm %s4172_s30, 512  ;;  %p3851_p7 = scmp.lt.s32.totalorder %s4172_s30, %s4642_s10 }
  0x39   : > { %p3846_p13 = scmp.ne.s32.totalorder %s4172_s30, %s3845_s27  ;;  %p3852_p9 = scmp.lt.s32.totalorder %s3850_s19, %s3845_s27 }
  0x3b   : > { %p3848_p2 = pnand %p3847_p0, %p3846_p13  ;;  %p3853_p10 = por %p3852_p9, %p3851_p7 }
  0x3d   : > { %p3849_p3 = pneg %p3848_p2 }
  0x3f   : > { %p3854_p11 = pnand %p3853_p10, %p3849_p3 }
  0x41   : > { %3857 = shalt.err (!%p3854_p11)
}
  0x42   : > { %s3858_s21 = scalar_lea.vmem %s4174_s4, 512  ;;  %s3972_s5 = smov [#allocation3]  }
  0x43   : > { %p3859_p12 = scmp.ne.s32.totalorder %s4174_s4, %s3858_s21  ;;  %s3863_s24 = sshll.u32 %s3972_s5, 4  ;;  %s3864_s24 = int_to_ptr.vmem [resolvable:$false] %s3863_s24 }
  0x44   : > { %s3865_s17 = scalar_lea.vmem %s3864_s24, 1024  ;;  %p3866_p2 = scmp.lt.s32.totalorder %s4174_s4, %s3864_s24 }
  0x45   : > { %p3861_p4 = pnand %p3859_p12, %p3847_p0  ;;  %p3867_p1 = scmp.lt.s32.totalorder %s3865_s17, %s3858_s21 }
  0x47   : > { %p3862_p13 = pneg %p3861_p4  ;;  %p3868_p5 = por %p3867_p1, %p3866_p2 }
  0x49   : > { %p3869_p6 = pnand %p3868_p5, %p3862_p13 }
  0x4b   : > { %3872 = shalt.err (!%p3869_p6)
}
  0x4c   : > { %s4644_s27 = smov 128   ;;  %p4645_p4 = scmp.ne.s32.totalorder %s4637_s29, 0 }
  0x4d   : > { %3709 = dma.hbm_to_vmem [thread:$0]  (!%p4176_p8), %s4172_s30, 512, %s4174_s4, %s4180_s22, %s4644_s27, %s4644_s27, %s3971_s2  }
  0x4e   : > { %707 = sbr.rel (%p4645_p4) target bundleno = 5069 (0x13cd), region = 100  ;;  %s709_s18 = sand.u32 (!%p4645_p4), 1, %s3959_s25  }
  0x4f   : > { %s3375_s24 = sshll.u32 (!%p4645_p4), %s709_s18, 5  ;;  %s710_s19 = scalar_lea.sflag (!%p4645_p4), [#allocation4], %s709_s18 }
  0x50   : > { %s4207_s20 = scalar_lea.vmem (!%p4645_p4), [#allocation3], %s3375_s24  ;;  %p4646_p1 = scmp.ne.s32.totalorder (!%p4645_p4), %s4636_s28, 0 }
  0x53   : > { %3938 = dma.done.wait (%p4646_p1), %s710_s19, 512  }
  0x54   : > { %3940 = vsyncadd (%p4646_p1), %s710_s19, 4294966784  ;;  %p4647_p5 = scmp.eq.s32.totalorder %s4119_s3, 0 }
  0x56   : > { %3942 = dma.done.wait (%p4647_p5), [#allocation7], 512   ;;  %p4648_p6 = pmov %p4647_p5 }
  0x57   : > { %p810_p8 = scmp.lt.s32.totalorder %s4119_s3, 1  ;;  %s4650_s21 = sld [smem:[#allocation22_spill]] }
  0x58   : > { %3944 = vsyncadd (%p4648_p6), [#allocation7], 4294966784  ;;  %s4651_s6 = sld [smem:[#allocation24_spill]]  ;;  %p4652_p0 = scmp.ne.s32.totalorder %s4119_s3, 0 }
  0x59   : > { %s4219_s29 = scalar_select %p810_p8, %s4119_s3, 1 }
  0x5a   : > { %s4653_s17 = sld [smem:[#allocation18_spill]] (!%p4652_p0) }
  0x5b   : > { %s3446_s28 = sshll.u32 %s4219_s29, 5  ;;  %s825_s10 = scalar_lea.vmem %s4596_s7, %s4219_s29 }
  0x5c   : > { %s3448_s23 = sshll.u32 %s4219_s29, 6  ;;  %s842_s27 = scalar_lea.vmem %s4602_s13, %s4219_s29 }
  0x5d   : > { %s4229_s5 = scalar_lea.vmem %s4650_s21, %s3446_s28  ;;  %s834_s21 = scalar_lea.vmem %s4600_s11, %s4219_s29 }
  0x5e   : > { %s4234_s18 = scalar_lea.vmem %s4651_s6, %s3446_s28  ;;  %s4260_s19 = scalar_lea.vmem %s4601_s12, %s3448_s23 }
  0x5f   : > { %s845_s26 = scalar_lea.vmem %s4603_s14, %s4219_s29  ;;  %s848_s4 = scalar_lea.vmem %s4604_s15, %s4219_s29 }
  0x60   : > { %852 = sbr.rel (%p4652_p0) target bundleno = 415 (0x19f), region = 112  ;;  %s4654_s16 = sld [smem:[#allocation20_spill]] (!%p4652_p0) }
  0x61   : > { %s4655_s30 = sld [smem:[#allocation21_spill]] (!%p4652_p0) }
  0x65   : > { %v853_v0 = vld [vmem:[%s4653_s17] sm:$0xff]  ;;  %vm857_vm0 = vcmask 261120   ;;  %v854_v1 = vld [vmem:[%s4653_s17 + $0x8] sm:$0xff] }
  0x66   : > { %v858_v2 = vsel %vm857_vm0, %v853_v0, 0.0  ;;  %v861_v3 = vsel %vm857_vm0, %v854_v1, 0.0  ;;  %v3384_v21 = vld [vmem:[%s4654_s16] ss:$0 sm:$0xff] }
  0x67   : > { %859 = vadd.xlane.f32.xlu0 %v858_v2  ;;  %v3385_v23 = vld [vmem:[%s4655_s30] ss:$0 sm:$0xff] }
  0x6b   : > { %862 = vadd.xlane.f32.xlu0 %v861_v3 }
  0xf0   : > { %v860_v4 = vpop.xlane.xlu0 %859 }
  0xf1   : > { %v865_v5 = vmul.f32 0.03125, %v860_v4 }
  0xf3   : > { %v867_v6 = vsub.f32 %v853_v0, %v865_v5 }
  0xf4   : > { %v863_v7 = vpop.xlane.xlu0 %862 }
  0xf5   : > { %v866_v8 = vmul.f32 0.03125, %v863_v7  ;;  %v869_v9 = vmul.f32 %v867_v6, %v867_v6 }
  0xf7   : > { %v868_v10 = vsub.f32 %v854_v1, %v866_v8  ;;  %v871_v11 = vsel %vm857_vm0, %v869_v9, 0.0 }
  0xf8   : > { %872 = vadd.xlane.f32.xlu1 %v871_v11 }
  0xf9   : > { %v870_v12 = vmul.f32 %v868_v10, %v868_v10 }
  0xfb   : > { %v874_v13 = vsel %vm857_vm0, %v870_v12, 0.0 }
  0xfc   : > { %875 = vadd.xlane.f32.xlu1 %v874_v13 }
 0x181   : > { %v873_v14 = vpop.xlane.xlu1 %872 }
 0x182   : > { %v877_v15 = vmul.f32 0.03125, %v873_v14 }
 0x184   : > { %v879_v16 = vadd.f32 1e-05, %v877_v15 }
 0x185   : > { %v876_v17 = vpop.xlane.xlu1 %875 }
 0x186   : > { %3769 = vrsqrt.f32 %v879_v16  ;;  %v878_v18 = vmul.f32 0.03125, %v876_v17 }
 0x188   : > { %v880_v19 = vadd.f32 1e-05, %v878_v18 }
 0x18a   : > { %3771 = vrsqrt.f32 %v880_v19 }
 0x193   : > { %v3770_v20 = vpop.eup %3769 }
 0x194   : > { %v883_v22 = vmul.f32 %v3770_v20, %v867_v6 }
 0x196   : > { %v891_v24 = vmul.f32 %v3384_v21, %v883_v22 }
 0x197   : > { %v3772_v25 = vpop.eup %3771 }
 0x198   : > { %v899_v26 = vadd.f32 %v3385_v23, %v891_v24  ;;  %v884_v27 = vmul.f32 %v3772_v25, %v868_v10 }
 0x19a   : > { %901 = vst.msk [vmem:[#allocation2] sm:$0xff] %vm857_vm0, %v899_v26  ;;  %v892_v28 = vmul.f32 %v3384_v21, %v884_v27 }
 0x19c   : > { %v900_v29 = vadd.f32 %v3385_v23, %v892_v28 }
 0x19e   : > { %902 = vst.msk [vmem:[#allocation2 + $0x8] sm:$0xff] %vm857_vm0, %v900_v29 }
 0x19f PF: > { %v908_v30 = vld [vmem:[%s4229_s5 + $0x18] sm:$0xff]  ;;  %v907_v31 = vld [vmem:[%s4229_s5 + $0x10] sm:$0xff]  ;;  %vm916_vm1 = vcmask 261120   ;;  %v906_v33 = vld [vmem:[%s4229_s5 + $0x8] sm:$0xff]  ;;  %v3973_v36 = vmov 0.0   ;;  %vm3974_vm2 = vmmov 0  }
 0x1a0   : > { %3525 = vmatprep.subr.mxu0 %v908_v30  ;;  %v905_v34 = vld [vmem:[%s4229_s5] sm:$0xff]  ;;  %3541 = vmatprep.subr.mxu1 %v3973_v36  ;;  %s4656_s0 = sld [smem:[#allocation23_spill]]  ;;  %s3975_s6 = smov 96   ;;  %vm1003_vm3 = vcmask 64512   ;;  %vm2860_vm4 = vcmask 523264  }
 0x1a1   : > { %v4292_v32 = vld [vmem:[#allocation2] sm:$0xff]  ;;  %3526 = vmatpush3.msra.mxu0 %v908_v30  ;;  %3543 = vmatprep.mubr.msk.f32.mxu1 %vm3974_vm2, %v3973_v36  ;;  %s4658_s16 = sld [smem:[#allocation19_spill]]  ;;  %s3976_s30 = smov 64  }
 0x1a2   : > { %3533 = vmatprep.mubr.msk.f32.mxu0 %vm916_vm1, %v4292_v32  ;;  %3527 = vmatprep.subr.mxu0 %v907_v31  ;;  %s3977_s5 = smov 120   ;;  %s3978_s22 = smov 88  }
 0x1a3   : > { %3528 = vmatpush3.msra.mxu0 %v907_v31  ;;  %s3982_s23 = smov 48   ;;  %s3983_s24 = smov 72  }
 0x1a4   : > { %3529 = vmatprep.subr.mxu0 %v906_v33  ;;  %s3984_s1 = smov 104   ;;  %s3985_s2 = smov 40  }
 0x1a5   : > { %3530 = vmatpush3.msra.mxu0 %v906_v33  ;;  %v4298_v35 = vld [vmem:[#allocation2 + $0x8] sm:$0xff]  ;;  %p3434_p3 = scmp.ne.s32.totalorder %s4119_s3, 1 }
 0x1a6   : > { %3531 = vmatprep.subr.mxu0 %v905_v34  ;;  %s4657_s28 = scalar_lea.vmem %s4656_s0, %s4219_s29  ;;  %s3979_s0 = smov 56  }
 0x1a7   : > { %3532 = vmatpush3.msra.mxu0 %v905_v34  ;;  %v3386_v38 = vld [vmem:[%s4657_s28] ss:$0 sm:$0xff]  ;;  %v4340_v50 = vld [vmem:[%s4658_s16 + $0x1] ss:$0 sm:$0xff]  ;;  %s3980_s28 = smov 112  }
 0x1a8   : > { %3534 = vmatmul.mubr.msk.f32.vlgmr.msra.gmra.mxu0 %vm916_vm1, %v4298_v35  ;;  %3536 = vmatprep.subr.mxu0 %v3973_v36  ;;  %v4334_v45 = vld [vmem:[%s4658_s16] ss:$0 sm:$0xff] }
 0x1a9   : > { %3538 = vmatprep.mubr.msk.f32.mxu0 %vm3974_vm2, %v3973_v36 }
 0x268   : > { %v3535_v37 = vpop.f32.mrf.mxu0 }
 0x269   : > { %v4316_v41 = vadd.f32 %v3535_v37, %v3386_v38 }
 0x26a   : > { %v989_v39 = vpop.f32.mrf.mxu0 }
 0x26b   : > { %v4313_v40 = vadd.f32 %v3386_v38, %v989_v39 }
 0x26d   : > { %1001 = vrot.lane.b32.xlu0 %v4313_v40, %s3975_s6 }
 0x271   : > { %1079 = vrot.lane.b32.xlu0 %v4316_v41, %s3975_s6  ;;  %s3981_s6 = smov 80  }
 0x2df   : > { %v1002_v42 = vpop.permute.xlu0 %1001 }
 0x2e0   : > { %3537 = vmatpush3.xpose.msk.msra.mxu0 %vm1003_vm3, %v1002_v42 }
 0x2e1   : > { %3546 = vmatprep.subr.mxu0 %v3973_v36 }
 0x2e3   : > { %3539 = vmatmul.mubr.msk.f32.vlgmr.msra.gmra.mxu0 %vm1003_vm3, %v4313_v40  ;;  %v1080_v43 = vpop.permute.xlu0 %1079 }
 0x2e4   : > { %3542 = vmatpush3.xpose.msk.msra.mxu1 %vm1003_vm3, %v1080_v43  ;;  %3548 = vmatprep.mubr.msk.f32.mxu0 %vm3974_vm2, %v3973_v36 }
 0x2e5   : > { %3551 = vmatprep.subr.mxu1 %v3973_v36 }
 0x2e7   : > { %3544 = vmatmul.mubr.msk.f32.vlgmr.msra.gmra.mxu1 %vm1003_vm3, %v4316_v41 }
 0x2e8   : > { %3553 = vmatprep.mubr.msk.f32.mxu1 %vm3974_vm2, %v3973_v36 }
 0x3a3   : > { %v1074_v44 = vpop.f32.mrf.mxu0 }
 0x3a4   : > { %v1155_v46 = vmul.f32 0.35355338, %v1074_v44  ;;  %v1345_v44 = vld [vmem:[%s4234_s18] sm:$0xff] }
 0x3a5   : > { %v3540_v47 = vpop.f32.mrf.mxu0 }
 0x3a6   : > { %v1169_v48 = vadd.f32 %v4334_v45, %v1155_v46 }
 0x3a7   : > { %v1151_v49 = vpop.f32.mrf.mxu1 }
 0x3a8   : > { %v1156_v51 = vmul.f32 0.35355338, %v1151_v49  ;;  %v1171_v52 = vsel %vm1003_vm3, %v1169_v48, -inf }
 0x3a9   : > { %1172 = vmax.xlane.f32.xlu1 %v1171_v52  ;;  %v3545_v53 = vpop.f32.mrf.mxu1 }
 0x3aa   : > { %v1170_v54 = vadd.f32 %v4340_v50, %v1156_v51 }
 0x3ac   : > { %v1174_v55 = vsel %vm1003_vm3, %v1170_v54, -inf }
 0x3ad   : > { %1175 = vmax.xlane.f32.xlu1 %v1174_v55 }
 0x432   : > { %v1173_v56 = vpop.xlane.xlu1 %1172 }
 0x433   : > { %v1177_v57 = vsub.f32 %v1169_v48, %v1173_v56 }
 0x435   : > { %v1179_v58 = vmul.f32 1.442695, %v1177_v57  ;;  %v1680_v57 = vld [vmem:[%s4234_s18 + $0x8] sm:$0xff] }
 0x436   : > { %v1176_v59 = vpop.xlane.xlu1 %1175 }
 0x437   : > { %3773 = vpow2.f32 %v1179_v58  ;;  %v1178_v60 = vsub.f32 %v1170_v54, %v1176_v59 }
 0x439   : > { %v1181_v61 = vmul.f32 1.442695, %v1178_v60 }
 0x43b   : > { %3775 = vpow2.f32 %v1181_v61 }
 0x444   : > { %v3774_v62 = vpop.eup %3773 }
 0x445   : > { %v1183_v63 = vsel %vm1003_vm3, %v3774_v62, 0.0 }
 0x446   : > { %1184 = vadd.xlane.f32.xlu0 %v1183_v63 }
 0x448   : > { %v3776_v0 = vpop.eup %3775 }
 0x449   : > { %v1186_v1 = vsel %vm1003_vm3, %v3776_v0, 0.0 }
 0x44a   : > { %1187 = vadd.xlane.f32.xlu1 %v1186_v1 }
 0x45b   : > { %1193 = vrot.lane.b32.xlu1 %v4313_v40, %s3976_s30 }
 0x45c   : > { %1346 = vrot.lane.b32.xlu0 %v4313_v40, %s3977_s5 }
 0x45f   : > { %1269 = vrot.lane.b32.xlu1 %v4316_v41, %s3976_s30 }
 0x463   : > { %1348 = vrot.lane.b32.xlu1 %v4313_v40, %s3978_s22 }
 0x467   : > { %1426 = vrot.lane.b32.xlu1 %v4316_v41, %s3978_s22 }
 0x46b   : > { %1424 = vrot.lane.b32.xlu1 %v4316_v41, %s3977_s5 }
 0x4cf   : > { %v1185_v2 = vpop.xlane.xlu0 %1184 }
 0x4d0   : > { %3777 = vrcp.f32 %v1185_v2 }
 0x4d3   : > { %v1188_v3 = vpop.xlane.xlu1 %1187  ;;  %v1347_v11 = vpop.permute.xlu0 %1346 }
 0x4d4   : > { %3779 = vrcp.f32 %v1188_v3 }
 0x4d7   : > { %v1194_v4 = vpop.permute.xlu1 %1193 }
 0x4d8   : > { %3547 = vmatpush3.msra.mxu0 %v1194_v4 }
 0x4d9   : > { %3556 = vmatprep.subr.mxu0 %v3973_v36 }
 0x4db   : > { %v1270_v5 = vpop.permute.xlu1 %1269 }
 0x4dc   : > { %3552 = vmatpush3.msra.mxu1 %v1270_v5 }
 0x4dd   : > { %v3778_v6 = vpop.eup %3777  ;;  %3561 = vmatprep.subr.mxu1 %v3973_v36 }
 0x4de   : > { %v1191_v7 = vmul.f32 %v3778_v6, %v3774_v62 }
 0x4df   : > { %v1349_v8 = vpop.permute.xlu1 %1348 }
 0x4e0   : > { %3549 = vmatmul.mubr.msk.f32.vlgmr.msra.gmra.mxu0 %vm1003_vm3, %v1191_v7 }
 0x4e1   : > { %v3780_v9 = vpop.eup %3779  ;;  %3557 = vmatpush3.xpose.msk.msra.mxu0 %vm1003_vm3, %v1349_v8  ;;  %3558 = vmatprep.mubr.msk.f32.mxu0 %vm3974_vm2, %v3973_v36 }
 0x4e2   : > { %v1192_v10 = vmul.f32 %v3780_v9, %v3776_v0  ;;  %3566 = vmatprep.subr.mxu0 %v3973_v36 }
 0x4e3   : > { %v1427_v12 = vpop.permute.xlu1 %1426 }
 0x4e4   : > { %3554 = vmatmul.mubr.msk.f32.vlgmr.msra.gmra.mxu1 %vm1003_vm3, %v1192_v10  ;;  %3559 = vmatmul.mubr.msk.f32.vlgmr.msra.gmra.mxu0 %vm1003_vm3, %v1347_v11 }
 0x4e5   : > { %3562 = vmatpush3.xpose.msk.msra.mxu1 %vm1003_vm3, %v1427_v12  ;;  %3563 = vmatprep.mubr.msk.f32.mxu1 %vm3974_vm2, %v3973_v36 }
 0x4e6   : > { %3571 = vmatprep.subr.mxu1 %v3973_v36  ;;  %3568 = vmatprep.mubr.msk.f32.mxu0 %vm3974_vm2, %v3973_v36 }
 0x4e7   : > { %v1425_v13 = vpop.permute.xlu1 %1424 }
 0x4e8   : > { %3564 = vmatmul.mubr.msk.f32.vlgmr.msra.gmra.mxu1 %vm1003_vm3, %v1425_v13 }
 0x4e9   : > { %3573 = vmatprep.mubr.msk.f32.mxu1 %vm3974_vm2, %v3973_v36 }
 0x5a0   : > { %v1265_v14 = vpop.f32.mrf.mxu0 }
 0x5a2   : > { %v3550_v15 = vpop.f32.mrf.mxu0 }
 0x5a4   : > { %v1341_v16 = vpop.f32.mrf.mxu1  ;;  %v1420_v17 = vpop.f32.mrf.mxu0 }
 0x5a5   : > { %v1502_v18 = vmul.f32 0.35355338, %v1420_v17 }
 0x5a6   : > { %v3555_v19 = vpop.f32.mrf.mxu1  ;;  %v3560_v20 = vpop.f32.mrf.mxu0 }
 0x5a7   : > { %v1504_v21 = vadd.f32 %v4334_v45, %v1502_v18 }
 0x5a8   : > { %v1498_v22 = vpop.f32.mrf.mxu1 }
 0x5a9   : > { %v1503_v23 = vmul.f32 0.35355338, %v1498_v22  ;;  %v1506_v24 = vsel %vm1003_vm3, %v1504_v21, -inf }
 0x5aa   : > { %v3565_v25 = vpop.f32.mrf.mxu1  ;;  %1507 = vmax.xlane.f32.xlu1 %v1506_v24 }
 0x5ab   : > { %v1505_v26 = vadd.f32 %v4340_v50, %v1503_v23 }
 0x5ad   : > { %v1509_v27 = vsel %vm1003_vm3, %v1505_v26, -inf }
 0x5ae   : > { %1510 = vmax.xlane.f32.xlu0 %v1509_v27 }
 0x5c4   : > { %1604 = vrot.lane.b32.xlu0 %v4316_v41, %s3979_s0 }
 0x5c8   : > { %1843 = vrot.lane.b32.xlu0 %v4313_v40, %s3980_s28 }
 0x633   : > { %v1508_v28 = vpop.xlane.xlu1 %1507 }
 0x634   : > { %v1512_v29 = vsub.f32 %v1504_v21, %v1508_v28 }
 0x636   : > { %v1514_v33 = vmul.f32 1.442695, %v1512_v29 }
 0x637   : > { %v1511_v30 = vpop.xlane.xlu0 %1510 }
 0x638   : > { %v1513_v31 = vsub.f32 %v1505_v26, %v1511_v30 }
 0x63a   : > { %v1516_v34 = vmul.f32 1.442695, %v1513_v31 }
 0x63b   : > { %v1605_v37 = vpop.permute.xlu0 %1604 }
 0x63c   : > { %3781 = vpow2.f32 %v1516_v34  ;;  %3572 = vmatpush3.msra.mxu1 %v1605_v37  ;;  %v2177_v34 = vld [vmem:[%s4234_s18 + $0x10] sm:$0xff] }
 0x63d   : > { %3783 = vpow2.f32 %v1514_v33  ;;  %3581 = vmatprep.subr.mxu1 %v1345_v44 }
 0x63f   : > { %v1844_v1 = vpop.permute.xlu0 %1843 }
 0x649   : > { %v3782_v38 = vpop.eup %3781 }
 0x64a   : > { %v1521_v39 = vsel %vm1003_vm3, %v3782_v38, 0.0  ;;  %v3784_v42 = vpop.eup %3783 }
 0x64b   : > { %1522 = vadd.xlane.f32.xlu1 %v1521_v39  ;;  %v1518_v43 = vsel %vm1003_vm3, %v3784_v42, 0.0 }
 0x64f   : > { %1519 = vadd.xlane.f32.xlu1 %v1518_v43 }
 0x660   : > { %1528 = vrot.lane.b32.xlu1 %v4313_v40, %s3979_s0 }
 0x664   : > { %1845 = vrot.lane.b32.xlu1 %v4313_v40, %s3981_s6 }
 0x668   : > { %1923 = vrot.lane.b32.xlu1 %v4316_v41, %s3981_s6  ;;  %s4662_s6 = sld [smem:[#allocation27_spill]] (!%p3434_p3) }
 0x66c   : > { %1921 = vrot.lane.b32.xlu1 %v4316_v41, %s3980_s28  ;;  %s4660_s28 = scalar_lea.vmem %s4598_s9, %s4219_s29 }
 0x6d4   : > { %v1523_v46 = vpop.xlane.xlu1 %1522 }
 0x6d5   : > { %3785 = vrcp.f32 %v1523_v46 }
 0x6d8   : > { %v1520_v47 = vpop.xlane.xlu1 %1519 }
 0x6d9   : > { %3787 = vrcp.f32 %v1520_v47 }
 0x6dc   : > { %v1529_v48 = vpop.permute.xlu1 %1528 }
 0x6dd   : > { %3567 = vmatpush3.msra.mxu0 %v1529_v48 }
 0x6de   : > { %3576 = vmatprep.subr.mxu0 %v1680_v57 }
 0x6e0   : > { %v1846_v49 = vpop.permute.xlu1 %1845 }
 0x6e2   : > { %v3786_v51 = vpop.eup %3785 }
 0x6e3   : > { %v1527_v52 = vmul.f32 %v3786_v51, %v3782_v38 }
 0x6e4   : > { %v1924_v54 = vpop.permute.xlu1 %1923 }
 0x6e5   : > { %3574 = vmatmul.mubr.msk.f32.vlgmr.msra.gmra.mxu1 %vm1003_vm3, %v1527_v52 }
 0x6e6   : > { %v3788_v53 = vpop.eup %3787  ;;  %3583 = vmatprep.mubr.msk.f32.mxu1 %vm1003_vm3, %v1265_v14  ;;  %3582 = vmatpush3.msra.mxu1 %v1345_v44 }
 0x6e7   : > { %3591 = vmatprep.subr.mxu1 %v3973_v36  ;;  %v1526_v55 = vmul.f32 %v3788_v53, %v3784_v42 }
 0x6e8   : > { %v1922_v56 = vpop.permute.xlu1 %1921 }
 0x6e9   : > { %3569 = vmatmul.mubr.msk.f32.vlgmr.msra.gmra.mxu0 %vm1003_vm3, %v1526_v55  ;;  %3584 = vmatmul.mubr.msk.f32.vlgmr.msra.gmra.mxu1 %vm1003_vm3, %v1341_v16 }
 0x6ea   : > { %3592 = vmatpush3.xpose.msk.msra.mxu1 %vm1003_vm3, %v1924_v54  ;;  %3593 = vmatprep.mubr.msk.f32.mxu1 %vm3974_vm2, %v3973_v36 }
 0x6eb   : > { %3601 = vmatprep.subr.mxu1 %v3973_v36  ;;  %3577 = vmatpush3.msra.mxu0 %v1680_v57 }
 0x6ec   : > { %3586 = vmatprep.subr.mxu0 %v3973_v36 }
 0x6ed   : > { %3594 = vmatmul.mubr.msk.f32.vlgmr.msra.gmra.mxu1 %vm1003_vm3, %v1922_v56 }
 0x6ee   : > { %3603 = vmatprep.mubr.msk.f32.mxu1 %vm3974_vm2, %v3973_v36 }
 0x7a5   : > { %v1676_v58 = vpop.f32.mrf.mxu1 }
 0x7a7   : > { %v3575_v59 = vpop.f32.mrf.mxu1 }
 0x7a9   : > { %v1600_v60 = vpop.f32.mrf.mxu0  ;;  %v4398_v61 = vpop.f32.mrf.mxu1 }
 0x7aa   : > { %3578 = vmatprep.mubr.msk.f32.mxu0 %vm1003_vm3, %v1600_v60 }
 0x7ab   : > { %v3570_v62 = vpop.f32.mrf.mxu0  ;;  %3579 = vmatmul.mubr.msk.f32.vlgmr.msra.gmra.mxu0 %vm1003_vm3, %v1676_v58  ;;  %v4402_v63 = vpop.f32.mrf.mxu1 }
 0x7ac   : > { %3587 = vmatpush3.xpose.msk.msra.mxu0 %vm1003_vm3, %v1846_v49  ;;  %3588 = vmatprep.mubr.msk.f32.mxu0 %vm3974_vm2, %v3973_v36 }
 0x7ad   : > { %v1995_v0 = vpop.f32.mrf.mxu1  ;;  %3596 = vmatprep.subr.mxu0 %v3973_v36 }
 0x7ae   : > { %v2000_v2 = vmul.f32 0.35355338, %v1995_v0 }
 0x7af   : > { %3589 = vmatmul.mubr.msk.f32.vlgmr.msra.gmra.mxu0 %vm1003_vm3, %v1844_v1  ;;  %v3595_v3 = vpop.f32.mrf.mxu1 }
 0x7b0   : > { %v2002_v4 = vadd.f32 %v4340_v50, %v2000_v2  ;;  %3598 = vmatprep.mubr.msk.f32.mxu0 %vm3974_vm2, %v3973_v36 }
 0x7b2   : > { %v2006_v5 = vsel %vm1003_vm3, %v2002_v4, -inf }
 0x7b3   : > { %2007 = vmax.xlane.f32.xlu1 %v2006_v5 }
 0x7c4   : > { %2025 = vrot.lane.b32.xlu1 %v4313_v40, %s3982_s23 }
 0x7c8   : > { %2263 = vrot.lane.b32.xlu1 %v4313_v40, %s3983_s24 }
 0x7cc   : > { %2341 = vrot.lane.b32.xlu1 %v4316_v41, %s3983_s24 }
 0x7d0   : > { %2339 = vrot.lane.b32.xlu1 %v4316_v41, %s3984_s1 }
 0x83c   : > { %v2008_v6 = vpop.xlane.xlu1 %2007 }
 0x83d   : > { %v2010_v8 = vsub.f32 %v2002_v4, %v2008_v6 }
 0x83f   : > { %v2013_v9 = vmul.f32 1.442695, %v2010_v8 }
 0x840   : > { %v2026_v7 = vpop.permute.xlu1 %2025 }
 0x841   : > { %3597 = vmatpush3.msra.mxu0 %v2026_v7  ;;  %3789 = vpow2.f32 %v2013_v9 }
 0x842   : > { %3606 = vmatprep.subr.mxu0 %v2177_v34 }
 0x844   : > { %v2264_v29 = vpop.permute.xlu1 %2263 }
 0x848   : > { %v2342_v47 = vpop.permute.xlu1 %2341 }
 0x84c   : > { %v2340_v51 = vpop.permute.xlu1 %2339 }
 0x84e   : > { %v3790_v17 = vpop.eup %3789 }
 0x84f   : > { %v2018_v18 = vsel %vm1003_vm3, %v3790_v17, 0.0 }
 0x86b   : > { %v4418_v10 = vpop.f32.mrf.mxu0 }
 0x86c   : > { %v1840_v56 = vadd.f32 %v4398_v61, %v4418_v10 }
 0x86d   : > { %v4420_v11 = vpop.f32.mrf.mxu0 }
 0x86e   : > { %v1835_v58 = vadd.f32 %v4402_v63, %v4420_v11 }
 0x86f   : > { %v1917_v12 = vpop.f32.mrf.mxu0 }
 0x870   : > { %v1999_v13 = vmul.f32 0.35355338, %v1917_v12 }
 0x871   : > { %v3590_v14 = vpop.f32.mrf.mxu0 }
 0x872   : > { %v2001_v15 = vadd.f32 %v4334_v45, %v1999_v13 }
 0x874   : > { %v2003_v16 = vsel %vm1003_vm3, %v2001_v15, -inf }
 0x875   : > { %2004 = vmax.xlane.f32.xlu0 %v2003_v16 }
 0x879   : > { %2019 = vadd.xlane.f32.xlu0 %v2018_v18  ;;  %v3423_v18 = vld [vmem:[%s825_s10] ss:$0 sm:$0xff] }
 0x8fe   : > { %v2005_v19 = vpop.xlane.xlu0 %2004 }
 0x8ff   : > { %v2009_v20 = vsub.f32 %v2001_v15, %v2005_v19 }
 0x901   : > { %v2011_v21 = vmul.f32 1.442695, %v2009_v20 }
 0x902   : > { %v2020_v24 = vpop.xlane.xlu0 %2019 }
 0x903   : > { %3791 = vpow2.f32 %v2011_v21 }
 0x904   : > { %3793 = vrcp.f32 %v2020_v24 }
 0x910   : > { %v3792_v22 = vpop.eup %3791 }
 0x911   : > { %v2015_v23 = vsel %vm1003_vm3, %v3792_v22, 0.0  ;;  %v3794_v26 = vpop.eup %3793 }
 0x912   : > { %2016 = vadd.xlane.f32.xlu0 %v2015_v23  ;;  %v2024_v28 = vmul.f32 %v3794_v26, %v3790_v17 }
 0x928   : > { %2101 = vrot.lane.b32.xlu0 %v4316_v41, %s3982_s23 }
 0x92c   : > { %2261 = vrot.lane.b32.xlu0 %v4313_v40, %s3984_s1 }
 0x99b   : > { %v2017_v25 = vpop.xlane.xlu0 %2016 }
 0x99c   : > { %3795 = vrcp.f32 %v2017_v25 }
 0x99f   : > { %v2102_v27 = vpop.permute.xlu0 %2101 }
 0x9a0   : > { %3602 = vmatpush3.msra.mxu1 %v2102_v27 }
 0x9a1   : > { %3604 = vmatmul.mubr.msk.f32.vlgmr.msra.gmra.mxu1 %vm1003_vm3, %v2024_v28  ;;  %3611 = vmatprep.subr.mxu1 %v3973_v36 }
 0x9a2   : > { %3612 = vmatpush3.xpose.msk.msra.mxu1 %vm1003_vm3, %v2264_v29  ;;  %3613 = vmatprep.mubr.msk.f32.mxu1 %vm3974_vm2, %v3973_v36 }
 0x9a3   : > { %v2262_v30 = vpop.permute.xlu0 %2261  ;;  %3621 = vmatprep.subr.mxu1 %v3973_v36 }
 0x9a5   : > { %3614 = vmatmul.mubr.msk.f32.vlgmr.msra.gmra.mxu1 %vm1003_vm3, %v2262_v30 }
 0x9a6   : > { %3623 = vmatprep.mubr.msk.f32.mxu1 %vm3974_vm2, %v3973_v36 }
 0x9a9   : > { %v3796_v31 = vpop.eup %3795 }
 0x9aa   : > { %v2023_v33 = vmul.f32 %v3796_v31, %v3792_v22 }
 0x9ac   : > { %3599 = vmatmul.mubr.msk.f32.vlgmr.msra.gmra.mxu0 %vm1003_vm3, %v2023_v33 }
 0x9ad   : > { %3607 = vmatpush3.msra.mxu0 %v2177_v34 }
 0x9ae   : > { %3616 = vmatprep.subr.mxu0 %v3973_v36 }
 0xa61   : > { %v2173_v37 = vpop.f32.mrf.mxu1 }
 0xa63   : > { %v3605_v38 = vpop.f32.mrf.mxu1 }
 0xa65   : > { %v2335_v39 = vpop.f32.mrf.mxu1 }
 0xa66   : > { %v2417_v42 = vmul.f32 0.35355338, %v2335_v39  ;;  %v2738_v39 = vld [vmem:[%s4207_s20 + $0x18] sm:$0xff] }
 0xa67   : > { %v3615_v43 = vpop.f32.mrf.mxu1 }
 0xa68   : > { %v2419_v44 = vadd.f32 %v4334_v45, %v2417_v42  ;;  %v2737_v42 = vld [vmem:[%s4207_s20 + $0x10] sm:$0xff]  ;;  %v2736_v43 = vld [vmem:[%s4207_s20 + $0x8] sm:$0xff] }
 0xa6a   : > { %v2421_v46 = vsel %vm1003_vm3, %v2419_v44, -inf }
 0xa6b   : > { %2422 = vmax.xlane.f32.xlu0 %v2421_v46 }
 0xa6c   : > { %v2097_v48 = vpop.f32.mrf.mxu0 }
 0xa6d   : > { %3608 = vmatprep.mubr.msk.f32.mxu0 %vm1003_vm3, %v2097_v48 }
 0xa6e   : > { %v3600_v49 = vpop.f32.mrf.mxu0  ;;  %3609 = vmatmul.mubr.msk.f32.vlgmr.msra.gmra.mxu0 %vm1003_vm3, %v2173_v37 }
 0xa6f   : > { %3617 = vmatpush3.xpose.msk.msra.mxu0 %vm1003_vm3, %v2342_v47  ;;  %3618 = vmatprep.mubr.msk.f32.mxu0 %vm3974_vm2, %v3973_v36 }
 0xa70   : > { %3626 = vmatprep.subr.mxu0 %v3973_v36 }
 0xa72   : > { %3619 = vmatmul.mubr.msk.f32.vlgmr.msra.gmra.mxu0 %vm1003_vm3, %v2340_v51 }
 0xa73   : > { %3628 = vmatprep.mubr.msk.f32.mxu0 %vm3974_vm2, %v3973_v36 }
 0xaf4   : > { %v2423_v45 = vpop.xlane.xlu0 %2422 }
 0xaf5   : > { %v2427_v52 = vsub.f32 %v2419_v44, %v2423_v45  ;;  %v2735_v44 = vld [vmem:[%s4207_s20] sm:$0xff]  ;;  %s4659_s20 = scalar_lea.vmem %s4597_s8, %s4219_s29 }
 0xaf7   : > { %v2429_v53 = vmul.f32 1.442695, %v2427_v52 }
 0xaf9   : > { %3797 = vpow2.f32 %v2429_v53  ;;  %v3424_v53 = vld [vmem:[%s4659_s20] ss:$0 sm:$0xff] }
 0xb06   : > { %v3798_v54 = vpop.eup %3797 }
 0xb07   : > { %v2433_v55 = vsel %vm1003_vm3, %v3798_v54, 0.0 }
 0xb08   : > { %2434 = vadd.xlane.f32.xlu0 %v2433_v55 }
 0xb2e   : > { %v3610_v57 = vpop.f32.mrf.mxu0 }
 0xb2f   : > { %v2260_v59 = vadd.f32 %v3610_v57, %v1840_v56 }
 0xb30   : > { %v2250_v60 = vpop.f32.mrf.mxu0 }
 0xb31   : > { %v2259_v62 = vadd.f32 %v2250_v60, %v1835_v58  ;;  %v3425_v58 = vld [vmem:[%s4660_s28] ss:$0 sm:$0xff] }
 0xb32   : > { %v2413_v0 = vpop.f32.mrf.mxu0 }
 0xb33   : > { %v2418_v36 = vmul.f32 0.35355338, %v2413_v0  ;;  %v2852_v0 = vld [vmem:[%s4260_s19 + $0x38] sm:$0xff] }
 0xb34   : > { %v3620_v1 = vpop.f32.mrf.mxu0 }
 0xb35   : > { %v2420_v2 = vadd.f32 %v4340_v50, %v2418_v36  ;;  %v2851_v36 = vld [vmem:[%s4260_s19 + $0x30] sm:$0xff]  ;;  %v2850_v1 = vld [vmem:[%s4260_s19 + $0x28] sm:$0xff] }
 0xb37   : > { %v2424_v3 = vsel %vm1003_vm3, %v2420_v2, -inf }
 0xb38   : > { %2425 = vmax.xlane.f32.xlu1 %v2424_v3  ;;  %v2848_v3 = vld [vmem:[%s4260_s19 + $0x18] sm:$0xff] }
 0xb49   : > { %2443 = vrot.lane.b32.xlu1 %v4313_v40, %s3985_s2  ;;  %v2595_v40 = vld [vmem:[%s4234_s18 + $0x18] sm:$0xff] }
 0xb91   : > { %v2435_v61 = vpop.xlane.xlu0 %2434 }
 0xb92   : > { %3799 = vrcp.f32 %v2435_v61  ;;  %v2847_v61 = vld [vmem:[%s4260_s19 + $0x10] sm:$0xff] }
 0xb9f   : > { %v3800_v5 = vpop.eup %3799 }
 0xba0   : > { %v2441_v8 = vmul.f32 %v3800_v5, %v3798_v54  ;;  %v2845_v5 = vld [vmem:[%s4260_s19] sm:$0xff] }
 0xbc1   : > { %v2426_v4 = vpop.xlane.xlu1 %2425 }
 0xbc2   : > { %v2428_v63 = vsub.f32 %v2420_v2, %v2426_v4  ;;  %v2849_v2 = vld [vmem:[%s4260_s19 + $0x20] sm:$0xff]  ;;  %v2846_v4 = vld [vmem:[%s4260_s19 + $0x8] sm:$0xff]  ;;  %s4663_s19 = sld [smem:[#allocation29_spill]] (!%p3434_p3) }
 0xbc4   : > { %v2431_v6 = vmul.f32 1.442695, %v2428_v63  ;;  %v3426_v63 = vld [vmem:[%s834_s21] ss:$0 sm:$0xff] }
 0xbc5   : > { %v2444_v7 = vpop.permute.xlu1 %2443 }
 0xbc6   : > { %3801 = vpow2.f32 %v2431_v6  ;;  %3622 = vmatpush3.msra.mxu1 %v2444_v7 }
 0xbc7   : > { %3624 = vmatmul.mubr.msk.f32.vlgmr.msra.gmra.mxu1 %vm1003_vm3, %v2441_v8  ;;  %3631 = vmatprep.subr.mxu1 %v2595_v40 }
 0xbc8   : > { %3632 = vmatpush3.msra.mxu1 %v2595_v40 }
 0xbc9   : > { %3647 = vmatprep.subr.mxu1 %v2852_v0 }
 0xbd3   : > { %v3802_v50 = vpop.eup %3801 }
 0xbd4   : > { %v2436_v9 = vsel %vm1003_vm3, %v3802_v50, 0.0 }
 0xbd5   : > { %2437 = vadd.xlane.f32.xlu0 %v2436_v9 }
 0xbeb   : > { %2519 = vrot.lane.b32.xlu0 %v4316_v41, %s3985_s2 }
 0xc5e   : > { %v2438_v10 = vpop.xlane.xlu0 %2437 }
 0xc5f   : > { %3803 = vrcp.f32 %v2438_v10 }
 0xc62   : > { %v2520_v11 = vpop.permute.xlu0 %2519 }
 0xc63   : > { %3627 = vmatpush3.msra.mxu0 %v2520_v11 }
 0xc64   : > { %3636 = vmatprep.subr.mxu0 %v2738_v39 }
 0xc6c   : > { %v3804_v12 = vpop.eup %3803 }
 0xc6d   : > { %v2442_v13 = vmul.f32 %v3804_v12, %v3802_v50 }
 0xc6f   : > { %3629 = vmatmul.mubr.msk.f32.vlgmr.msra.gmra.mxu0 %vm1003_vm3, %v2442_v13 }
 0xc70   : > { %3637 = vmatpush3.msra.mxu0 %v2738_v39 }
 0xc71   : > { %3638 = vmatprep.subr.mxu0 %v2737_v42 }
 0xc72   : > { %3639 = vmatpush3.msra.mxu0 %v2737_v42 }
 0xc73   : > { %3640 = vmatprep.subr.mxu0 %v2736_v43 }
 0xc74   : > { %3641 = vmatpush3.msra.mxu0 %v2736_v43 }
 0xc75   : > { %3642 = vmatprep.subr.mxu0 %v2735_v44 }
 0xc76   : > { %3643 = vmatpush3.msra.mxu0 %v2735_v44 }
 0xc87   : > { %v2515_v14 = vpop.f32.mrf.mxu1 }
 0xc88   : > { %3633 = vmatprep.mubr.msk.f32.mxu1 %vm1003_vm3, %v2515_v14 }
 0xc89   : > { %v3625_v15 = vpop.f32.mrf.mxu1 }
 0xd2f   : > { %v2591_v16 = vpop.f32.mrf.mxu0 }
 0xd30   : > { %3634 = vmatmul.mubr.msk.f32.vlgmr.msra.gmra.mxu1 %vm1003_vm3, %v2591_v16 }
 0xd31   : > { %v3630_v41 = vpop.f32.mrf.mxu0  ;;  %3648 = vmatpush3.msra.mxu1 %v2852_v0 }
 0xd32   : > { %3649 = vmatprep.subr.mxu1 %v2851_v36 }
 0xd33   : > { %3650 = vmatpush3.msra.mxu1 %v2851_v36 }
 0xd34   : > { %3651 = vmatprep.subr.mxu1 %v2850_v1 }
 0xd35   : > { %3652 = vmatpush3.msra.mxu1 %v2850_v1 }
 0xd36   : > { %3653 = vmatprep.subr.mxu1 %v2849_v2 }
 0xd37   : > { %3654 = vmatpush3.msra.mxu1 %v2849_v2 }
 0xd38   : > { %3655 = vmatprep.subr.mxu1 %v2848_v3 }
 0xd39   : > { %3656 = vmatpush3.msra.mxu1 %v2848_v3 }
 0xd3a   : > { %3657 = vmatprep.subr.mxu1 %v2847_v61 }
 0xd3b   : > { %3658 = vmatpush3.msra.mxu1 %v2847_v61 }
 0xd3c   : > { %3659 = vmatprep.subr.mxu1 %v2846_v4 }
 0xd3d   : > { %3660 = vmatpush3.msra.mxu1 %v2846_v4 }
 0xd3e   : > { %3661 = vmatprep.subr.mxu1 %v2845_v5 }
 0xd3f   : > { %3662 = vmatpush3.msra.mxu1 %v2845_v5 }
 0xdf0   : > { %v3635_v17 = vpop.f32.mrf.mxu1 }
 0xdf1   : > { %v2678_v19 = vadd.f32 %v3635_v17, %v2260_v59 }
 0xdf2   : > { %v2668_v20 = vpop.f32.mrf.mxu1 }
 0xdf3   : > { %v2687_v21 = vadd.f32 %v3423_v18, %v2678_v19  ;;  %v2677_v22 = vadd.f32 %v2668_v20, %v2259_v62 }
 0xdf5   : > { %v2686_v23 = vadd.f32 %v3423_v18, %v2677_v22  ;;  %v2689_v24 = vadd.f32 %v2687_v21, %v4298_v35 }
 0xdf7   : > { %v2695_v25 = vsel %vm916_vm1, %v2689_v24, 0.0  ;;  %v2688_v26 = vadd.f32 %v2686_v23, %v4292_v32 }
 0xdf8   : > { %2696 = vadd.xlane.f32.xlu0 %v2695_v25  ;;  %v3429_v25 = vld [vmem:[%s842_s27] ss:$0 sm:$0xff] }
 0xdf9   : > { %v2692_v27 = vsel %vm916_vm1, %v2688_v26, 0.0 }
 0xdfa   : > { %2693 = vadd.xlane.f32.xlu1 %v2692_v27 }
 0xe81   : > { %v2697_v28 = vpop.xlane.xlu0 %2696 }
 0xe82   : > { %v2700_v29 = vmul.f32 0.03125, %v2697_v28 }
 0xe83   : > { %v2694_v30 = vpop.xlane.xlu1 %2693 }
 0xe84   : > { %v2702_v31 = vsub.f32 %v2689_v24, %v2700_v29  ;;  %v2699_v33 = vmul.f32 0.03125, %v2694_v30 }
 0xe86   : > { %v2701_v34 = vsub.f32 %v2688_v26, %v2699_v33  ;;  %v2704_v37 = vmul.f32 %v2702_v31, %v2702_v31 }
 0xe88   : > { %v2708_v35 = vsel %vm916_vm1, %v2704_v37, 0.0  ;;  %v2703_v38 = vmul.f32 %v2701_v34, %v2701_v34 }
 0xe89   : > { %2709 = vadd.xlane.f32.xlu0 %v2708_v35 }
 0xe8a   : > { %v2705_v32 = vsel %vm916_vm1, %v2703_v38, 0.0 }
 0xe8b   : > { %2706 = vadd.xlane.f32.xlu1 %v2705_v32 }
 0xf12   : > { %v2710_v46 = vpop.xlane.xlu0 %2709 }
 0xf13   : > { %v2712_v47 = vmul.f32 0.03125, %v2710_v46 }
 0xf14   : > { %v2707_v48 = vpop.xlane.xlu1 %2706 }
 0xf15   : > { %v2714_v49 = vadd.f32 1e-05, %v2712_v47  ;;  %v2711_v51 = vmul.f32 0.03125, %v2707_v48 }
 0xf17   : > { %3805 = vrsqrt.f32 %v2714_v49  ;;  %v2713_v45 = vadd.f32 1e-05, %v2711_v51 }
 0xf19   : > { %3807 = vrsqrt.f32 %v2713_v45 }
 0xf24   : > { %v3806_v52 = vpop.eup %3805 }
 0xf25   : > { %v2718_v54 = vmul.f32 %v3806_v52, %v2702_v31 }
 0xf26   : > { %v3808_v55 = vpop.eup %3807 }
 0xf27   : > { %v2717_v56 = vmul.f32 %v3808_v55, %v2701_v34  ;;  %v2726_v57 = vmul.f32 %v3424_v53, %v2718_v54  ;;  %v3432_v55 = vld [vmem:[%s845_s26] ss:$0 sm:$0xff] }
 0xf29   : > { %v2725_v59 = vmul.f32 %v3424_v53, %v2717_v56  ;;  %v2734_v62 = vadd.f32 %v3425_v58, %v2726_v57 }
 0xf2b   : > { %v4492_v60 = vadd.f32 %v3425_v58, %v2725_v59  ;;  %v3433_v58 = vld [vmem:[%s848_s4] ss:$0 sm:$0xff]  ;;  %s4661_s4 = sld [smem:[#allocation28_spill]] (!%p3434_p3) }
 0xf2d   : > { %3644 = vmatprep.mubr.msk.f32.mxu0 %vm916_vm1, %v4492_v60 }
 0xf2e   : > { %3645 = vmatmul.mubr.msk.f32.vlgmr.msra.gmra.mxu0 %vm916_vm1, %v2734_v62 }
 0xfee   : > { %v3646_v6 = vpop.f32.mrf.mxu0 }
 0xfef   : > { %v2824_v7 = vadd.f32 %v3646_v6, %v3426_v63 }
 0xff0   : > { %v2818_v8 = vpop.f32.mrf.mxu0 }
 0xff1   : > { %v2828_v50 = vmul.f32 %v2824_v7, %v2824_v7  ;;  %v2819_v9 = vadd.f32 %v3426_v63, %v2818_v8 }
 0xff3   : > { %v2830_v40 = vmul.f32 %v2828_v50, %v2824_v7  ;;  %v2827_v10 = vmul.f32 %v2819_v9, %v2819_v9 }
 0xff5   : > { %v2832_v11 = vmul.f32 0.044715, %v2830_v40  ;;  %v2829_v12 = vmul.f32 %v2827_v10, %v2819_v9 }
 0xff7   : > { %v2834_v13 = vadd.f32 %v2832_v11, %v2824_v7  ;;  %v2831_v14 = vmul.f32 0.044715, %v2829_v12 }
 0xff9   : > { %v2836_v15 = vmul.f32 0.7978846, %v2834_v13  ;;  %v2833_v16 = vadd.f32 %v2831_v14, %v2819_v9 }
 0xffb   : > { %3809 = vtanh.f32 %v2836_v15  ;;  %v2835_v41 = vmul.f32 0.7978846, %v2833_v16 }
 0xffd   : > { %3811 = vtanh.f32 %v2835_v41 }
0x1008   : > { %v3810_v17 = vpop.eup %3809 }
0x1009   : > { %v2840_v18 = vadd.f32 1.0, %v3810_v17 }
0x100a   : > { %v3812_v19 = vpop.eup %3811 }
0x100b   : > { %v2839_v20 = vadd.f32 1.0, %v3812_v19  ;;  %v2842_v21 = vmul.f32 0.5, %v2840_v18 }
0x100d   : > { %v2841_v22 = vmul.f32 0.5, %v2839_v20  ;;  %v2844_v24 = vmul.f32 %v2842_v21, %v2824_v7 }
0x100f   : > { %v2843_v23 = vmul.f32 %v2841_v22, %v2819_v9 }
0x1011   : > { %3663 = vmatprep.mubr.msk.f32.mxu1 %vm2860_vm4, %v2843_v23 }
0x1012   : > { %3664 = vmatmul.mubr.msk.f32.vlgmr.msra.gmra.mxu1 %vm2860_vm4, %v2844_v24 }
0x10d2   : > { %v3665_v26 = vpop.f32.mrf.mxu1 }
0x10d3   : > { %v2939_v27 = vadd.f32 %v3665_v26, %v3429_v25 }
0x10d4   : > { %v2933_v28 = vpop.f32.mrf.mxu1 }
0x10d5   : > { %v2934_v29 = vadd.f32 %v3429_v25, %v2933_v28  ;;  %v2943_v30 = vadd.f32 %v2939_v27, %v2734_v62 }
0x10d7   : > { %v2949_v31 = vsel %vm916_vm1, %v2943_v30, 0.0  ;;  %v2942_v33 = vadd.f32 %v2934_v29, %v4492_v60 }
0x10d8   : > { %2950 = vadd.xlane.f32.xlu0 %v2949_v31 }
0x10d9   : > { %v2946_v34 = vsel %vm916_vm1, %v2942_v33, 0.0 }
0x10da   : > { %2947 = vadd.xlane.f32.xlu1 %v2946_v34 }
0x1161   : > { %v2951_v37 = vpop.xlane.xlu0 %2950 }
0x1162   : > { %v2953_v35 = vmul.f32 0.03125, %v2951_v37 }
0x1163   : > { %v2948_v38 = vpop.xlane.xlu1 %2947 }
0x1164   : > { %v2955_v32 = vsub.f32 %v2943_v30, %v2953_v35  ;;  %v2952_v39 = vmul.f32 0.03125, %v2948_v38 }
0x1166   : > { %v2954_v42 = vsub.f32 %v2942_v33, %v2952_v39  ;;  %v2957_v43 = vmul.f32 %v2955_v32, %v2955_v32 }
0x1168   : > { %v2961_v44 = vsel %vm916_vm1, %v2957_v43, 0.0  ;;  %v2956_v46 = vmul.f32 %v2954_v42, %v2954_v42 }
0x1169   : > { %2962 = vadd.xlane.f32.xlu0 %v2961_v44 }
0x116a   : > { %v2958_v47 = vsel %vm916_vm1, %v2956_v46, 0.0 }
0x116b   : > { %2959 = vadd.xlane.f32.xlu1 %v2958_v47 }
0x11f2   : > { %v2963_v48 = vpop.xlane.xlu0 %2962 }
0x11f3   : > { %v2965_v49 = vmul.f32 0.03125, %v2963_v48 }
0x11f4   : > { %v2960_v51 = vpop.xlane.xlu1 %2959 }
0x11f5   : > { %v2967_v45 = vadd.f32 1e-05, %v2965_v49  ;;  %v2964_v52 = vmul.f32 0.03125, %v2960_v51 }
0x11f7   : > { %3813 = vrsqrt.f32 %v2967_v45  ;;  %v2966_v53 = vadd.f32 1e-05, %v2964_v52 }
0x11f9   : > { %3815 = vrsqrt.f32 %v2966_v53 }
0x1204   : > { %v3814_v54 = vpop.eup %3813 }
0x1205   : > { %v2971_v56 = vmul.f32 %v3814_v54, %v2955_v32 }
0x1206   : > { %v3816_v57 = vpop.eup %3815 }
0x1207   : > { %v2979_v59 = vmul.f32 %v3432_v55, %v2971_v56  ;;  %v2970_v60 = vmul.f32 %v3816_v57, %v2954_v42 }
0x1209   : > { %v2987_v62 = vadd.f32 %v3433_v58, %v2979_v59  ;;  %v2978_v0 = vmul.f32 %v3432_v55, %v2970_v60  ;;  %2993 = sbr.rel (%p3434_p3) target bundleno = 5036 (0x13ac), region = 116 }
0x120b   : > { %2989 = vst.msk [vmem:[#allocation2 + $0x8] sm:$0xff] %vm916_vm1, %v2987_v62  ;;  %v2986_v36 = vadd.f32 %v3433_v58, %v2978_v0 }
0x120d   : > { %2988 = vst.msk [vmem:[#allocation2] sm:$0xff] %vm916_vm1, %v2986_v36 }
0x120e   : > { %v2997_v1 = vld [vmem:[#allocation6 + $0x18] sm:$0xff]  ;;  %v3986_v2 = vmov 0.0   ;;  %v2996_v3 = vld [vmem:[#allocation6 + $0x10] sm:$0xff]  ;;  %vm3987_vm5 = vmmov 0   ;;  %v3007_v61 = vrot.slane %v2987_v62, 7  ;;  %v2995_v4 = vld [vmem:[#allocation6 + $0x8] sm:$0xff] }
0x120f   : > { %3666 = vmatprep.subr.mxu0 %v3986_v2  ;;  %3674 = vmatprep.mubr.msk.f32.mxu0 %vm3987_vm5, %v3986_v2  ;;  %vm3008_vm6 = vcmask 1041409   ;;  %v2994_v5 = vld [vmem:[#allocation6] sm:$0xff]  ;;  %v3088_v6 = vld [vmem:[%s4661_s4 + $0x18] sm:$0xff]  ;;  %v3086_v8 = vld [vmem:[%s4661_s4 + $0x8] sm:$0xff]  ;;  %vm3083_vm7 = vcmask 254976  }
0x1210   : > { %3667 = vmatpush3.msra.mxu0 %v2997_v1  ;;  %3677 = vmatprep.subr.mxu1 %v3986_v2  ;;  %v3009_v63 = vsel %vm3008_vm6, %v3007_v61, %v2986_v36  ;;  %v3087_v7 = vld [vmem:[%s4661_s4 + $0x10] sm:$0xff]  ;;  %v3085_v50 = vld [vmem:[%s4661_s4] sm:$0xff] }
0x1211   : > { %3668 = vmatprep.subr.mxu0 %v3986_v2  ;;  %3685 = vmatprep.mubr.msk.f32.mxu1 %vm3987_vm5, %v3986_v2  ;;  %v3435_v9 = vld [vmem:[%s4662_s6] ss:$0 sm:$0xff] }
0x1212   : > { %3669 = vmatpush3.msra.mxu0 %v2996_v3  ;;  %3678 = vmatpush3.msra.mxu1 %v3088_v6  ;;  %v3437_v13 = vld [vmem:[%s4663_s19] ss:$0 sm:$0xff] }
0x1213   : > { %3670 = vmatprep.subr.mxu0 %v3986_v2  ;;  %3679 = vmatprep.subr.mxu1 %v3986_v2 }
0x1214   : > { %3671 = vmatpush3.msra.mxu0 %v2995_v4  ;;  %3680 = vmatpush3.msra.mxu1 %v3087_v7 }
0x1215   : > { %3672 = vmatprep.subr.mxu0 %v3986_v2  ;;  %3681 = vmatprep.subr.mxu1 %v3986_v2 }
0x1216   : > { %3673 = vmatpush3.msra.mxu0 %v2994_v5  ;;  %3682 = vmatpush3.msra.mxu1 %v3086_v8 }
0x1217   : > { %3675 = vmatmul.mubr.msk.f32.vlgmr.msra.gmra.mxu0 %vm916_vm1, %v3009_v63  ;;  %3683 = vmatprep.subr.mxu1 %v3986_v2 }
0x1218   : > { %3684 = vmatpush3.msra.mxu1 %v3085_v50 }
0x12d7   : > { %v3078_v40 = vpop.f32.mrf.mxu0 }
0x12d8   : > { %v3079_v10 = vadd.f32 %v3435_v9, %v3078_v40 }
0x12d9   : > { %v3676_v11 = vpop.f32.mrf.mxu0 }
0x12da   : > { %3817 = vtanh.f32 %v3079_v10 }
0x12e7   : > { %v3818_v12 = vpop.eup %3817 }
0x12e8   : > { %3084 = vst.msk [vmem:[#allocation9] sm:$0x3] %vm3083_vm7, %v3818_v12  ;;  %3686 = vmatmul.mubr.msk.f32.vlgmr.msra.gmra.mxu1 %vm916_vm1, %v3818_v12 }
0x13a8   : > { %v3165_v14 = vpop.f32.mrf.mxu1 }
0x13a9   : > { %v3166_v15 = vadd.f32 %v3437_v13, %v3165_v14 }
0x13aa   : > { %v3687_v16 = vpop.f32.mrf.mxu1 }
0x13ab   : > { %3169 = vst [vmem:[#allocation8] sm:$0x3] %v3166_v15 }
0x13ac PF: > { %p3713_p7 = scmp.eq.s32.totalorder %s4119_s3, 1  ;;  %s3988_s27 = smov [#allocation8]  }
0x13ad   : > { %s3177_s24 = sshll.u32 %s3988_s27, 4  ;;  %s3989_s1 = smov [#allocation9]   ;;  %s3178_s24 = int_to_ptr.vmem [resolvable:$true] %s3177_s24 }
0x13ae   : > { %s3188_s2 = sshll.u32 %s3989_s1, 4  ;;  %s3873_s26 = scalar_lea.vmem %s3178_s24, 32  ;;  %s3189_s2 = int_to_ptr.vmem [resolvable:$true] %s3188_s2 }
0x13af   : > { %p3874_p9 = scmp.ne.s32.totalorder %s3178_s24, %s3873_s26  ;;  %p3880_p12 = scmp.lt.s32.totalorder %s3178_s24, %s3178_s24 }
0x13b0   : > { %p3881_p13 = scmp.lt.s32.totalorder %s3873_s26, %s3873_s26 }
0x13b1   : > { %p3875_p10 = pnand %p3874_p9, %p3713_p7 }
0x13b2   : > { %p3882_p2 = por %p3881_p13, %p3880_p12 }
0x13b3   : > { %p3876_p11 = pneg %p3875_p10 }
0x13b5   : > { %p3883_p4 = pnand %p3882_p2, %p3876_p11 }
0x13b7   : > { %3886 = shalt.err (!%p3883_p4)
}
0x13b8   : > { %s4664_s30 = sld [smem:[#allocation30_spill]]  ;;  %s3897_s10 = scalar_lea.vmem %s3189_s2, 32 }
0x13b9   : > { %p3898_p1 = scmp.ne.s32.totalorder %s3189_s2, %s3897_s10  ;;  %p3904_p8 = scmp.lt.s32.totalorder %s3189_s2, %s3189_s2 }
0x13ba   : > { %p3905_p0 = scmp.lt.s32.totalorder %s3897_s10, %s3897_s10 }
0x13bb   : > { %p3899_p5 = pnand %p3898_p1, %p3713_p7 }
0x13bc   : > { %p3906_p3 = por %p3905_p0, %p3904_p8 }
0x13bd   : > { %p3900_p6 = pneg %p3899_p5 }
0x13be   : > { %3695 = dma.vmem_to_hbm [thread:$0]  (%p3713_p7), %s3178_s24, 32, %s4664_s30, [#allocation5]  }
0x13bf   : > { %p3907_p9 = pnand %p3906_p3, %p3900_p6 }
0x13c1   : > { %3910 = shalt.err (!%p3907_p9)
}
0x13c2   : > { %s4665_s22 = sld [smem:[#allocation31_spill]] }
0x13c8   : > { %3697 = dma.vmem_to_hbm [thread:$0]  (%p3713_p7), %s3189_s2, 32, %s4665_s22, [#allocation10]  }
0x13c9   : > { %3946 = dma.done.wait (%p3713_p7), [#allocation5], 32  }
0x13ca   : > { %3948 = vsyncadd (%p3713_p7), [#allocation5], 4294967264 }
0x13cb   : > { %3950 = dma.done.wait (%p3713_p7), [#allocation10], 32  }
0x13cc   : > { %3952 = vsyncadd (%p3713_p7), [#allocation10], 4294967264 }
0x13cd PF: > { %s4666_s27 = sld [smem:[#allocation16_spill]]  ;;  %s4669_s2 = smov %s3959_s25 }
0x13ce   : > { %s4667_s0 = sld [smem:[#allocation15_spill]] }
0x13cf   : > { %s4668_s26 = sld [smem:[#allocation17_spill]] }
0x13d3   : > { %p35_p10 = scmp.ge.s32.totalorder %s4666_s27, 4  }
0x13d4   : > { %s4670_s25 = smov %s4667_s0 }
0x13d5   :  { %37 = sbr.rel (!%p35_p10) target bundleno = 21 (0x15), region = 190 }
0x13da   :  { %3205 = vsyncpa [#allocation4], 1 }
0x13db   :  { %3207 = vsyncpa [#allocation4 + $0x1], 1 }
0x13dc   :  { %3208 = vsyncpa [#allocation7], 1 }
0x13dd   :  { %3209 = vsyncpa [#allocation5], 1 }
0x13de   :  { %3211 = vsyncpa [#allocation5 + $0x1], 1 }
0x13df   :  { %3212 = vsyncpa [#allocation10], 1 }

</bundles_post_ra>
